<compile_context>
chip_gen: v5e
topology: v5e:2x2
jax: 0.10.0
libtpu: 0.0.40
codegen_flags: <defaults>
</compile_context>

<pallas_src>
import math
import functools

import jax
import jax.numpy as jnp
from jax import lax
from jax.experimental import pallas as pl
from jax.experimental.pallas import tpu as pltpu

_VMEM_LIMIT_BYTES = 64 * 1024 * 1024  # explicit: v5e's scoped default is only 16 MiB


def _choose_tile_rows(n_rows, max_tile_rows, min_grid=4):
    """Largest multiple-of-8 tile that divides n_rows, capped at max_tile_rows and,
    when the problem is big enough, leaving >= min_grid grid steps (>= 2 per core on
    v7x megacore).  Falls back to the full extent for tiny inputs."""
    cap = min(max_tile_rows, n_rows)
    if n_rows // min_grid >= 8:
        cap = min(cap, n_rows // min_grid)
    tr = (cap // 8) * 8
    while tr >= 8 and n_rows % tr != 0:
        tr -= 8
    if tr >= 8:
        return tr
    return n_rows  # full-extent block (allowed by the (8,128) rule)


# ---------------------------------------------------------------------------
# Kernel 1: ray/AABB near-far + background blend + depth normalization.
# Inputs are channel-major slabs; outputs are two lane-dense slabs:
#   scalars (3, R, 128) rows = [near, far, depth_normalized]
#   image   (C, R, 128)
# ---------------------------------------------------------------------------
def _ray_composite_kernel(o_ref, d_ref, ws_ref, dep_ref, img_ref,
                          sc_ref, img_out_ref,
                          *, aabb, min_near, bg_color, n_channels):
    eps = 1e-15
    big = 3.4028235e38
    near = None
    far = None
    # Slab test one coordinate at a time: pairwise min/max on the VPU
    # (no cross-sublane XLU reductions).
    for c in range(3):
        o = o_ref[c]                                        # (TR, 128)
        d = d_ref[c]
        # guard zero direction components (0 * inf = NaN in the unguarded test)
        d = jnp.where(jnp.abs(d) < eps, jnp.where(d >= 0, eps, -eps), d)
        inv = 1.0 / d
        t1 = (aabb[c] - o) * inv
        t2 = (aabb[c + 3] - o) * inv
        tmin = jnp.minimum(t1, t2)
        tmax = jnp.maximum(t1, t2)
        near = tmin if near is None else jnp.maximum(near, tmin)
        far = tmax if far is None else jnp.minimum(far, tmax)

    miss = near > far
    near = jnp.where(miss, big, near)
    far = jnp.where(miss, big, far)
    near = jnp.maximum(near, min_near)
    sc_ref[0] = near
    sc_ref[1] = far

    ws = ws_ref[...]
    dep = dep_ref[...]
    denom = far - near
    # guarded: missed rays (near == far == big) produce 0 instead of 0/0 = NaN
    sc_ref[2] = jnp.where(denom > 0, jnp.maximum(dep - near, 0.0) / denom, 0.0)

    bg = (1.0 - ws) * bg_color
    for c in range(n_channels):
        img_out_ref[c] = img_ref[c] + bg


def ray_near_far_and_composite(rays_o_cm, rays_d_cm, weights_sum, depth,
                               image_cm, aabb, min_near, bg_color=1.0,
                               tile_rows=512):
    """rays_o_cm / rays_d_cm: (3, N); image_cm: (C, N); weights_sum / depth: (N,).

    Returns two channel-major slabs (no wrapper-side re-slicing HBM passes):
      scalars (3, N): rows = [near, far, depth_normalized]
      image   (C, N): composited image with background blend."""
    C, N = image_cm.shape
    assert N % 128 == 0, "N must be a multiple of 128"
    R = N // 128
    tr = _choose_tile_rows(R, tile_rows)
    assert R % tr == 0

    o3 = rays_o_cm.astype(jnp.float32).reshape(3, R, 128)
    d3 = rays_d_cm.astype(jnp.float32).reshape(3, R, 128)
    ws2 = weights_sum.astype(jnp.float32).reshape(R, 128)   # free re-views, no stack
    dep2 = depth.astype(jnp.float32).reshape(R, 128)
    img = image_cm.astype(jnp.float32).reshape(C, R, 128)

    kern = functools.partial(
        _ray_composite_kernel,
        aabb=tuple(float(a) for a in aabb),
        min_near=float(min_near), bg_color=float(bg_color), n_channels=C)

    scalars3, img_out3 = pl.pallas_call(
        kern,
        out_shape=(jax.ShapeDtypeStruct((3, R, 128), jnp.float32),
                   jax.ShapeDtypeStruct((C, R, 128), jnp.float32)),
        grid_spec=pltpu.PrefetchScalarGridSpec(
            num_scalar_prefetch=0,
            grid=(R // tr,),
            in_specs=[pl.BlockSpec((3, tr, 128), lambda i: (0, i, 0)),
                      pl.BlockSpec((3, tr, 128), lambda i: (0, i, 0)),
                      pl.BlockSpec((tr, 128), lambda i: (i, 0)),
                      pl.BlockSpec((tr, 128), lambda i: (i, 0)),
                      pl.BlockSpec((C, tr, 128), lambda i: (0, i, 0))],
            out_specs=(pl.BlockSpec((3, tr, 128), lambda i: (0, i, 0)),
                       pl.BlockSpec((C, tr, 128), lambda i: (0, i, 0)))),
        compiler_params=pltpu.CompilerParams(
            dimension_semantics=("parallel",),
            vmem_limit_bytes=_VMEM_LIMIT_BYTES),
    )(o3, d3, ws2, dep2, img)

    scalars = scalars3.reshape(3, N)     # contiguous re-view
    image_out = img_out3.reshape(C, N)
    return scalars, image_out


# ---------------------------------------------------------------------------
# Kernel 2: mark_untrained_grid visibility count (sum over poses).
# Points are a (3, R, 128) slab; pose tables are flat 1-D scalar-prefetch operands
# (single SMEM DMA before the grid runs); the pose loop is an unrolled fori_loop of
# pure VPU work on full (TR, 128) vregs.
# ---------------------------------------------------------------------------
def _visibility_count_kernel(Rm_ref, t_ref, xyz_ref, count_ref,
                             *, num_poses, cxfx, cyfy, half_grid, scale, unroll):
    # world coordinates for this cascade (scale folded in-kernel)
    x = xyz_ref[0] * scale                                  # (TR, 128), full vregs
    y = xyz_ref[1] * scale
    z = xyz_ref[2] * scale
    thresh = 2.0 * half_grid

    # TODO(synk): for realistic pose counts (B in the hundreds) the 3x3 rotation below
    # should be offloaded to the idle MXU (pack all rotations into one (3, 3B) operand,
    # one K=3 matmul per point tile, keep only the compares/ANDs/accumulate on the VPU);
    # the VPU path is kept here since it is the right choice for small B.
    def body(b, acc):
        px = x - t_ref[3 * b + 0]
        py = y - t_ref[3 * b + 1]
        pz = z - t_ref[3 * b + 2]
        # cam = (xyz - t) @ R   (R row-major, 9 scalars per pose in SMEM)
        camx = px * Rm_ref[9 * b + 0] + py * Rm_ref[9 * b + 3] + pz * Rm_ref[9 * b + 6]
        camy = px * Rm_ref[9 * b + 1] + py * Rm_ref[9 * b + 4] + pz * Rm_ref[9 * b + 7]
        camz = px * Rm_ref[9 * b + 2] + py * Rm_ref[9 * b + 5] + pz * Rm_ref[9 * b + 8]
        m = ((camz > 0)
             & (jnp.abs(camx) < cxfx * camz + thresh)
             & (jnp.abs(camy) < cyfy * camz + thresh))
        return acc + m.astype(jnp.float32)

    count_ref[...] = lax.fori_loop(
        0, num_poses, body, jnp.zeros(count_ref.shape, jnp.float32),
        unroll=unroll)


def mark_untrained_count(coords_unit_cm, poses, intrinsic, bound, cascade_idx,
                         grid_size, tile_rows=512):
    """coords_unit_cm: (3, M) grid coords in [-1, 1] (channel-major); poses: (B, 4, 4).
    Returns per-point visibility counts, shape (M,)."""
    fx, fy, cx, cy = intrinsic
    cas_bound = min(2 ** cascade_idx, bound)
    half_grid = cas_bound / grid_size
    M = coords_unit_cm.shape[1]
    assert M % 128 == 0
    Rr = M // 128
    tr = _choose_tile_rows(Rr, tile_rows)
    assert Rr % tr == 0
    B = poses.shape[0]

    # flat 1-D SMEM tables (2-D SMEM pads to [ceil(R/8)*8, 128] words and blows up
    # at realistic pose counts); scalar-prefetched so they land in SMEM once, up front.
    R_flat = poses[:, :3, :3].astype(jnp.float32).reshape(9 * B)
    t_flat = poses[:, :3, 3].astype(jnp.float32).reshape(3 * B)
    xyz3 = coords_unit_cm.astype(jnp.float32).reshape(3, Rr, 128)

    kern = functools.partial(
        _visibility_count_kernel, num_poses=B,
        cxfx=float(cx) / float(fx), cyfy=float(cy) / float(fy),
        half_grid=float(half_grid), scale=float(cas_bound - half_grid),
        unroll=max(1, min(B, 8)))

    counts2d = pl.pallas_call(
        kern,
        out_shape=jax.ShapeDtypeStruct((Rr, 128), jnp.float32),
        grid_spec=pltpu.PrefetchScalarGridSpec(
            num_scalar_prefetch=2,
            grid=(Rr // tr,),
            in_specs=[pl.BlockSpec((3, tr, 128), lambda i, *_: (0, i, 0))],
            out_specs=pl.BlockSpec((tr, 128), lambda i, *_: (i, 0))),
        compiler_params=pltpu.CompilerParams(
            dimension_semantics=("parallel",)),
    )(R_flat, t_flat, xyz3)
    # TODO(synk): raymarching.morton3D index computation + the scatter of these counts
    # into density_grid (and the count==0 -> -1 write) is an external CUDA op and is
    # not reproduced here.
    return counts2d.reshape(M)


# ---------------------------------------------------------------------------
# Kernel 3: update_extra_state density-grid decay/max + mean density.
# Grid is reshaped to (rows, 128); updated in place (donated + aliased); each tile
# emits an (8,128) partial sum via a sublane-preserving reshape + jnp.sum (no long
# serial add chain, few live vregs); final cross-lane reduce happens outside so the
# grid axis stays fully parallel (megacore-friendly).
# ---------------------------------------------------------------------------
def _grid_update_kernel(grid_ref, tmp_ref, out_ref, psum_ref, *, decay):
    g = grid_ref[...]                                       # (TRg, 128)
    t = tmp_ref[...]
    valid = (g >= 0.0) & (t >= 0.0)
    new = jnp.where(valid, jnp.maximum(g * decay, t), g)
    out_ref[...] = new

    clamped = jnp.maximum(new, 0.0)
    nrows = clamped.shape[0]
    # (TRg,128) -> (TRg//8, 8, 128) is a pure re-view (no (8,128) tile crossing);
    # the axis-0 reduce is plain VPU adds on whole vregs.
    psum_ref[0] = jnp.sum(clamped.reshape(nrows // 8, 8, 128), axis=0)


@functools.partial(jax.jit, static_argnums=(2, 3), donate_argnums=(0,))
def _update_density_grid_jit(density_grid, tmp_grid, decay, tile_rows):
    C_, G = density_grid.shape
    total = C_ * G
    assert total % 128 == 0
    Rr = total // 128
    tr = _choose_tile_rows(Rr, tile_rows)
    assert Rr % tr == 0 and tr % 8 == 0
    ntiles = Rr // tr

    # grid is stored float32 -> astype is a no-op, reshape is a free re-view, so the
    # donated buffer really is reused by input_output_aliases={0: 0}.
    g2 = density_grid.astype(jnp.float32).reshape(Rr, 128)
    t2 = tmp_grid.astype(jnp.float32).reshape(Rr, 128)
    kern = functools.partial(_grid_update_kernel, decay=float(decay))

    new2, partial = pl.pallas_call(
        kern,
        out_shape=(jax.ShapeDtypeStruct((Rr, 128), jnp.float32),
                   jax.ShapeDtypeStruct((ntiles, 8, 128), jnp.float32)),
        grid_spec=pltpu.PrefetchScalarGridSpec(
            num_scalar_prefetch=0,
            grid=(ntiles,),
            in_specs=[pl.BlockSpec((tr, 128), lambda i: (i, 0)),
                      pl.BlockSpec((tr, 128), lambda i: (i, 0))],
            out_specs=(pl.BlockSpec((tr, 128), lambda i: (i, 0)),
                       pl.BlockSpec((1, 8, 128), lambda i: (i, 0, 0)))),
        input_output_aliases={0: 0},        # update the density grid in place
        compiler_params=pltpu.CompilerParams(
            dimension_semantics=("parallel",),
            vmem_limit_bytes=_VMEM_LIMIT_BYTES),
    )(g2, t2)

    new_grid = new2.reshape(C_, G)
    mean_density = jnp.sum(partial) / float(total)
    # TODO(synk): raymarching.packbits (density bitfield packing) has no clean Pallas
    # equivalent here and is omitted.
    return new_grid, mean_density


def update_density_grid(density_grid, tmp_grid, decay=0.95, tile_rows=2048):
    """density_grid / tmp_grid: (cascade, grid_size**3) float32.
    density_grid is DONATED (updated in place). Returns (new_grid, mean_density)."""
    return _update_density_grid_jit(density_grid, tmp_grid, float(decay), int(tile_rows))


# ---------------------------------------------------------------------------
if __name__ == "__main__":
    key = jax.random.PRNGKey(0)

    # NeRFRenderer.__init__ constants (deterministic, in-script)
    bound = 1
    grid_size = 128
    min_near = 0.2
    cascade = 1 + math.ceil(math.log2(bound))               # = 1
    aabb = (-bound, -bound, -bound, bound, bound, bound)

    # --- 1) per-ray composite path (near_far_from_aabb + tail of run_cuda/infer_rays) ---
    N, C = 16384, 3
    k1, k2, k3, k4, k5 = jax.random.split(key, 5)
    rays_o = jax.random.uniform(k1, (3, N), jnp.float32, -0.5, 0.5)      # channel-major
    rays_d = jax.random.normal(k2, (3, N), jnp.float32)
    rays_d = rays_d / jnp.linalg.norm(rays_d, axis=0, keepdims=True)
    # stand-ins for the outputs of the external raymarching composite kernels
    weights_sum = jax.random.uniform(k3, (N,), jnp.float32, 0.0, 1.0)
    depth = jax.random.uniform(k4, (N,), jnp.float32, 0.2, 2.0)
    image = jax.random.uniform(k5, (C, N), jnp.float32)                  # channel-major
    ray_scalars, image_out = ray_near_far_and_composite(
        rays_o, rays_d, weights_sum, depth, image, aabb, min_near, bg_color=1.0)
    # ray_scalars rows: [near, far, depth_normalized]

    # --- 2) mark_untrained_grid visibility-count hot path ---
    M, B = 16384, 8
    k6, k7, k8 = jax.random.split(k5, 3)
    coords_unit = jax.random.uniform(k6, (3, M), jnp.float32, -1.0, 1.0)
    angles = jax.random.uniform(k7, (B,), jnp.float32, 0.0, 2.0 * math.pi)
    ca, sa = jnp.cos(angles), jnp.sin(angles)
    zeros, ones = jnp.zeros_like(ca), jnp.ones_like(ca)
    Rmat = jnp.stack([jnp.stack([ca, -sa, zeros], -1),
                      jnp.stack([sa, ca, zeros], -1),
                      jnp.stack([zeros, zeros, ones], -1)], -2)          # (B, 3, 3)
    tvec = jax.random.uniform(k8, (B, 3), jnp.float32, -2.0, 2.0)
    bottom = jnp.tile(jnp.array([[[0., 0., 0., 1.]]], jnp.float32), (B, 1, 1))
    poses = jnp.concatenate(
        [jnp.concatenate([Rmat, tvec[:, :, None]], axis=2), bottom], axis=1)  # (B,4,4)
    intrinsic = (100.0, 100.0, 64.0, 64.0)                               # fx, fy, cx, cy
    counts = mark_untrained_count(coords_unit, poses, intrinsic, bound,
                                  cascade_idx=0, grid_size=grid_size)

    # --- 3) update_extra_state density-grid maintenance ---
    G = 128 * 1024                     # small stand-in for grid_size**3 = 128**3
    k9, k10 = jax.random.split(k8, 2)
    density_grid = jax.random.uniform(k9, (cascade, G), jnp.float32, -0.5, 1.0)
    tmp_grid = jax.random.uniform(k10, (cascade, G), jnp.float32, -0.5, 1.0)
    new_grid, mean_density = update_density_grid(density_grid, tmp_grid, decay=0.95)

    for out in (ray_scalars, image_out, counts, new_grid, mean_density):
        jax.block_until_ready(out)
    print("KERNEL_OK")
</pallas_src>

<mosaic_0001>
module attributes {stable_mosaic.version = 11 : i64} {
  func.func @_ray_composite_kernel(%arg0: i32, %arg1: memref<3x32x128xf32, #tpu.memory_space<vmem>>, %arg2: memref<3x32x128xf32, #tpu.memory_space<vmem>>, %arg3: memref<32x128xf32, #tpu.memory_space<vmem>>, %arg4: memref<32x128xf32, #tpu.memory_space<vmem>>, %arg5: memref<3x32x128xf32, #tpu.memory_space<vmem>>, %arg6: memref<3x32x128xf32, #tpu.memory_space<vmem>>, %arg7: memref<3x32x128xf32, #tpu.memory_space<vmem>>) attributes {dimension_semantics = [#tpu.dimension_semantics<parallel>], iteration_bounds = array<i64: 4>, scalar_prefetch = 0 : i64, scratch_operands = 0 : i64, tpu.core_type = #tpu.core_type<tc>, window_params = [{transform_indices = @transform_0, window_bounds = array<i64: 3, 32, 128>}, {transform_indices = @transform_1, window_bounds = array<i64: 3, 32, 128>}, {transform_indices = @transform_2, window_bounds = array<i64: 32, 128>}, {transform_indices = @transform_3, window_bounds = array<i64: 32, 128>}, {transform_indices = @transform_4, window_bounds = array<i64: 3, 32, 128>}, {transform_indices = @transform_5, window_bounds = array<i64: 3, 32, 128>}, {transform_indices = @transform_6, window_bounds = array<i64: 3, 32, 128>}]} {
    %c0 = arith.constant 0 : index
    %c0_0 = arith.constant 0 : index
    %c0_1 = arith.constant 0 : index
    %0 = vector.load %arg1[%c0, %c0_0, %c0_1] : memref<3x32x128xf32, #tpu.memory_space<vmem>>, vector<1x32x128xf32>
    %1 = vector.shape_cast %0 : vector<1x32x128xf32> to vector<32x128xf32>
    %c0_2 = arith.constant 0 : index
    %c0_3 = arith.constant 0 : index
    %c0_4 = arith.constant 0 : index
    %2 = vector.load %arg2[%c0_2, %c0_3, %c0_4] : memref<3x32x128xf32, #tpu.memory_space<vmem>>, vector<1x32x128xf32>
    %3 = vector.shape_cast %2 : vector<1x32x128xf32> to vector<32x128xf32>
    %4 = math.absf %3 : vector<32x128xf32>
    %cst = arith.constant 1.000000e-15 : f32
    %5 = vector.broadcast %cst : f32 to vector<32x128xf32>
    %6 = arith.cmpf olt, %4, %5 : vector<32x128xf32>
    %cst_5 = arith.constant 0.000000e+00 : f32
    %7 = vector.broadcast %cst_5 : f32 to vector<32x128xf32>
    %8 = arith.cmpf oge, %3, %7 : vector<32x128xf32>
    %cst_6 = arith.constant 1.000000e-15 : f32
    %cst_7 = arith.constant -1.000000e-15 : f32
    %9 = vector.broadcast %cst_6 : f32 to vector<32x128xf32>
    %10 = vector.broadcast %cst_7 : f32 to vector<32x128xf32>
    %11 = arith.select %8, %9, %10 : vector<32x128xi1>, vector<32x128xf32>
    %12 = arith.select %6, %11, %3 : vector<32x128xi1>, vector<32x128xf32>
    %cst_8 = arith.constant 1.000000e+00 : f32
    %13 = vector.broadcast %cst_8 : f32 to vector<32x128xf32>
    %14 = arith.divf %13, %12 : vector<32x128xf32>
    %cst_9 = arith.constant -1.000000e+00 : f32
    %15 = vector.broadcast %cst_9 : f32 to vector<32x128xf32>
    %16 = arith.subf %15, %1 : vector<32x128xf32>
    %17 = arith.mulf %16, %14 : vector<32x128xf32>
    %cst_10 = arith.constant 1.000000e+00 : f32
    %18 = vector.broadcast %cst_10 : f32 to vector<32x128xf32>
    %19 = arith.subf %18, %1 : vector<32x128xf32>
    %20 = arith.mulf %19, %14 : vector<32x128xf32>
    %21 = arith.minimumf %17, %20 : vector<32x128xf32>
    %22 = arith.maximumf %17, %20 : vector<32x128xf32>
    %c1 = arith.constant 1 : index
    %c0_11 = arith.constant 0 : index
    %c0_12 = arith.constant 0 : index
    %23 = vector.load %arg1[%c1, %c0_11, %c0_12] : memref<3x32x128xf32, #tpu.memory_space<vmem>>, vector<1x32x128xf32>
    %24 = vector.shape_cast %23 : vector<1x32x128xf32> to vector<32x128xf32>
    %c1_13 = arith.constant 1 : index
    %c0_14 = arith.constant 0 : index
    %c0_15 = arith.constant 0 : index
    %25 = vector.load %arg2[%c1_13, %c0_14, %c0_15] : memref<3x32x128xf32, #tpu.memory_space<vmem>>, vector<1x32x128xf32>
    %26 = vector.shape_cast %25 : vector<1x32x128xf32> to vector<32x128xf32>
    %27 = math.absf %26 : vector<32x128xf32>
    %cst_16 = arith.constant 1.000000e-15 : f32
    %28 = vector.broadcast %cst_16 : f32 to vector<32x128xf32>
    %29 = arith.cmpf olt, %27, %28 : vector<32x128xf32>
    %cst_17 = arith.constant 0.000000e+00 : f32
    %30 = vector.broadcast %cst_17 : f32 to vector<32x128xf32>
    %31 = arith.cmpf oge, %26, %30 : vector<32x128xf32>
    %cst_18 = arith.constant 1.000000e-15 : f32
    %cst_19 = arith.constant -1.000000e-15 : f32
    %32 = vector.broadcast %cst_18 : f32 to vector<32x128xf32>
    %33 = vector.broadcast %cst_19 : f32 to vector<32x128xf32>
    %34 = arith.select %31, %32, %33 : vector<32x128xi1>, vector<32x128xf32>
    %35 = arith.select %29, %34, %26 : vector<32x128xi1>, vector<32x128xf32>
    %cst_20 = arith.constant 1.000000e+00 : f32
    %36 = vector.broadcast %cst_20 : f32 to vector<32x128xf32>
    %37 = arith.divf %36, %35 : vector<32x128xf32>
    %cst_21 = arith.constant -1.000000e+00 : f32
    %38 = vector.broadcast %cst_21 : f32 to vector<32x128xf32>
    %39 = arith.subf %38, %24 : vector<32x128xf32>
    %40 = arith.mulf %39, %37 : vector<32x128xf32>
    %cst_22 = arith.constant 1.000000e+00 : f32
    %41 = vector.broadcast %cst_22 : f32 to vector<32x128xf32>
    %42 = arith.subf %41, %24 : vector<32x128xf32>
    %43 = arith.mulf %42, %37 : vector<32x128xf32>
    %44 = arith.minimumf %40, %43 : vector<32x128xf32>
    %45 = arith.maximumf %40, %43 : vector<32x128xf32>
    %46 = arith.maximumf %21, %44 : vector<32x128xf32>
    %47 = arith.minimumf %22, %45 : vector<32x128xf32>
    %c2 = arith.constant 2 : index
    %c0_23 = arith.constant 0 : index
    %c0_24 = arith.constant 0 : index
    %48 = vector.load %arg1[%c2, %c0_23, %c0_24] : memref<3x32x128xf32, #tpu.memory_space<vmem>>, vector<1x32x128xf32>
    %49 = vector.shape_cast %48 : vector<1x32x128xf32> to vector<32x128xf32>
    %c2_25 = arith.constant 2 : index
    %c0_26 = arith.constant 0 : index
    %c0_27 = arith.constant 0 : index
    %50 = vector.load %arg2[%c2_25, %c0_26, %c0_27] : memref<3x32x128xf32, #tpu.memory_space<vmem>>, vector<1x32x128xf32>
    %51 = vector.shape_cast %50 : vector<1x32x128xf32> to vector<32x128xf32>
    %52 = math.absf %51 : vector<32x128xf32>
    %cst_28 = arith.constant 1.000000e-15 : f32
    %53 = vector.broadcast %cst_28 : f32 to vector<32x128xf32>
    %54 = arith.cmpf olt, %52, %53 : vector<32x128xf32>
    %cst_29 = arith.constant 0.000000e+00 : f32
    %55 = vector.broadcast %cst_29 : f32 to vector<32x128xf32>
    %56 = arith.cmpf oge, %51, %55 : vector<32x128xf32>
    %cst_30 = arith.constant 1.000000e-15 : f32
    %cst_31 = arith.constant -1.000000e-15 : f32
    %57 = vector.broadcast %cst_30 : f32 to vector<32x128xf32>
    %58 = vector.broadcast %cst_31 : f32 to vector<32x128xf32>
    %59 = arith.select %56, %57, %58 : vector<32x128xi1>, vector<32x128xf32>
    %60 = arith.select %54, %59, %51 : vector<32x128xi1>, vector<32x128xf32>
    %cst_32 = arith.constant 1.000000e+00 : f32
    %61 = vector.broadcast %cst_32 : f32 to vector<32x128xf32>
    %62 = arith.divf %61, %60 : vector<32x128xf32>
    %cst_33 = arith.constant -1.000000e+00 : f32
    %63 = vector.broadcast %cst_33 : f32 to vector<32x128xf32>
    %64 = arith.subf %63, %49 : vector<32x128xf32>
    %65 = arith.mulf %64, %62 : vector<32x128xf32>
    %cst_34 = arith.constant 1.000000e+00 : f32
    %66 = vector.broadcast %cst_34 : f32 to vector<32x128xf32>
    %67 = arith.subf %66, %49 : vector<32x128xf32>
    %68 = arith.mulf %67, %62 : vector<32x128xf32>
    %69 = arith.minimumf %65, %68 : vector<32x128xf32>
    %70 = arith.maximumf %65, %68 : vector<32x128xf32>
    %71 = arith.maximumf %46, %69 : vector<32x128xf32>
    %72 = arith.minimumf %47, %70 : vector<32x128xf32>
    %73 = arith.cmpf ogt, %71, %72 : vector<32x128xf32>
    %cst_35 = arith.constant 3.40282347E+38 : f32
    %74 = vector.broadcast %cst_35 : f32 to vector<32x128xf32>
    %75 = arith.select %73, %74, %71 : vector<32x128xi1>, vector<32x128xf32>
    %cst_36 = arith.constant 3.40282347E+38 : f32
    %76 = vector.broadcast %cst_36 : f32 to vector<32x128xf32>
    %77 = arith.select %73, %76, %72 : vector<32x128xi1>, vector<32x128xf32>
    %cst_37 = arith.constant 2.000000e-01 : f32
    %78 = vector.broadcast %cst_37 : f32 to vector<32x128xf32>
    %79 = arith.maximumf %75, %78 : vector<32x128xf32>
    %c0_38 = arith.constant 0 : index
    %c0_39 = arith.constant 0 : index
    %c0_40 = arith.constant 0 : index
    %80 = vector.load %arg6[%c0_38, %c0_39, %c0_40] : memref<3x32x128xf32, #tpu.memory_space<vmem>>, vector<1x32x128xf32>
    %81 = vector.shape_cast %80 : vector<1x32x128xf32> to vector<32x128xf32>
    %82 = vector.shape_cast %79 : vector<32x128xf32> to vector<1x32x128xf32>
    tpu.vector_store %arg6[%c0_38, %c0_39, %c0_40], %82 {strides = array<i32>} : memref<3x32x128xf32, #tpu.memory_space<vmem>>, vector<1x32x128xf32>,
    %c1_41 = arith.constant 1 : index
    %c0_42 = arith.constant 0 : index
    %c0_43 = arith.constant 0 : index
    %83 = vector.load %arg6[%c1_41, %c0_42, %c0_43] : memref<3x32x128xf32, #tpu.memory_space<vmem>>, vector<1x32x128xf32>
    %84 = vector.shape_cast %83 : vector<1x32x128xf32> to vector<32x128xf32>
    %85 = vector.shape_cast %77 : vector<32x128xf32> to vector<1x32x128xf32>
    tpu.vector_store %arg6[%c1_41, %c0_42, %c0_43], %85 {strides = array<i32>} : memref<3x32x128xf32, #tpu.memory_space<vmem>>, vector<1x32x128xf32>,
    %c0_44 = arith.constant 0 : index
    %c0_45 = arith.constant 0 : index
    %86 = vector.load %arg3[%c0_44, %c0_45] : memref<32x128xf32, #tpu.memory_space<vmem>>, vector<32x128xf32>
    %c0_46 = arith.constant 0 : index
    %c0_47 = arith.constant 0 : index
    %87 = vector.load %arg4[%c0_46, %c0_47] : memref<32x128xf32, #tpu.memory_space<vmem>>, vector<32x128xf32>
    %88 = arith.subf %77, %79 : vector<32x128xf32>
    %cst_48 = arith.constant 0.000000e+00 : f32
    %89 = vector.broadcast %cst_48 : f32 to vector<32x128xf32>
    %90 = arith.cmpf ogt, %88, %89 : vector<32x128xf32>
    %91 = arith.subf %87, %79 : vector<32x128xf32>
    %cst_49 = arith.constant 0.000000e+00 : f32
    %92 = vector.broadcast %cst_49 : f32 to vector<32x128xf32>
    %93 = arith.maximumf %91, %92 : vector<32x128xf32>
    %94 = arith.divf %93, %88 : vector<32x128xf32>
    %cst_50 = arith.constant 0.000000e+00 : f32
    %95 = vector.broadcast %cst_50 : f32 to vector<32x128xf32>
    %96 = arith.select %90, %94, %95 : vector<32x128xi1>, vector<32x128xf32>
    %c2_51 = arith.constant 2 : index
    %c0_52 = arith.constant 0 : index
    %c0_53 = arith.constant 0 : index
    %97 = vector.load %arg6[%c2_51, %c0_52, %c0_53] : memref<3x32x128xf32, #tpu.memory_space<vmem>>, vector<1x32x128xf32>
    %98 = vector.shape_cast %97 : vector<1x32x128xf32> to vector<32x128xf32>
    %99 = vector.shape_cast %96 : vector<32x128xf32> to vector<1x32x128xf32>
    tpu.vector_store %arg6[%c2_51, %c0_52, %c0_53], %99 {strides = array<i32>} : memref<3x32x128xf32, #tpu.memory_space<vmem>>, vector<1x32x128xf32>,
    %cst_54 = arith.constant 1.000000e+00 : f32
    %100 = vector.broadcast %cst_54 : f32 to vector<32x128xf32>
    %101 = arith.subf %100, %86 : vector<32x128xf32>
    %cst_55 = arith.constant 1.000000e+00 : f32
    %102 = vector.broadcast %cst_55 : f32 to vector<32x128xf32>
    %103 = arith.mulf %101, %102 : vector<32x128xf32>
    %c0_56 = arith.constant 0 : index
    %c0_57 = arith.constant 0 : index
    %c0_58 = arith.constant 0 : index
    %104 = vector.load %arg5[%c0_56, %c0_57, %c0_58] : memref<3x32x128xf32, #tpu.memory_space<vmem>>, vector<1x32x128xf32>
    %105 = vector.shape_cast %104 : vector<1x32x128xf32> to vector<32x128xf32>
    %106 = arith.addf %105, %103 : vector<32x128xf32>
    %c0_59 = arith.constant 0 : index
    %c0_60 = arith.constant 0 : index
    %c0_61 = arith.constant 0 : index
    %107 = vector.load %arg7[%c0_59, %c0_60, %c0_61] : memref<3x32x128xf32, #tpu.memory_space<vmem>>, vector<1x32x128xf32>
    %108 = vector.shape_cast %107 : vector<1x32x128xf32> to vector<32x128xf32>
    %109 = vector.shape_cast %106 : vector<32x128xf32> to vector<1x32x128xf32>
    tpu.vector_store %arg7[%c0_59, %c0_60, %c0_61], %109 {strides = array<i32>} : memref<3x32x128xf32, #tpu.memory_space<vmem>>, vector<1x32x128xf32>,
    %c1_62 = arith.constant 1 : index
    %c0_63 = arith.constant 0 : index
    %c0_64 = arith.constant 0 : index
    %110 = vector.load %arg5[%c1_62, %c0_63, %c0_64] : memref<3x32x128xf32, #tpu.memory_space<vmem>>, vector<1x32x128xf32>
    %111 = vector.shape_cast %110 : vector<1x32x128xf32> to vector<32x128xf32>
    %112 = arith.addf %111, %103 : vector<32x128xf32>
    %c1_65 = arith.constant 1 : index
    %c0_66 = arith.constant 0 : index
    %c0_67 = arith.constant 0 : index
    %113 = vector.load %arg7[%c1_65, %c0_66, %c0_67] : memref<3x32x128xf32, #tpu.memory_space<vmem>>, vector<1x32x128xf32>
    %114 = vector.shape_cast %113 : vector<1x32x128xf32> to vector<32x128xf32>
    %115 = vector.shape_cast %112 : vector<32x128xf32> to vector<1x32x128xf32>
    tpu.vector_store %arg7[%c1_65, %c0_66, %c0_67], %115 {strides = array<i32>} : memref<3x32x128xf32, #tpu.memory_space<vmem>>, vector<1x32x128xf32>,
    %c2_68 = arith.constant 2 : index
    %c0_69 = arith.constant 0 : index
    %c0_70 = arith.constant 0 : index
    %116 = vector.load %arg5[%c2_68, %c0_69, %c0_70] : memref<3x32x128xf32, #tpu.memory_space<vmem>>, vector<1x32x128xf32>
    %117 = vector.shape_cast %116 : vector<1x32x128xf32> to vector<32x128xf32>
    %118 = arith.addf %117, %103 : vector<32x128xf32>
    %c2_71 = arith.constant 2 : index
    %c0_72 = arith.constant 0 : index
    %c0_73 = arith.constant 0 : index
    %119 = vector.load %arg7[%c2_71, %c0_72, %c0_73] : memref<3x32x128xf32, #tpu.memory_space<vmem>>, vector<1x32x128xf32>
    %120 = vector.shape_cast %119 : vector<1x32x128xf32> to vector<32x128xf32>
    %121 = vector.shape_cast %118 : vector<32x128xf32> to vector<1x32x128xf32>
    tpu.vector_store %arg7[%c2_71, %c0_72, %c0_73], %121 {strides = array<i32>} : memref<3x32x128xf32, #tpu.memory_space<vmem>>, vector<1x32x128xf32>,
    return
  }
  func.func @transform_0(%arg0: i32) -> (i32, i32, i32) {
    %c0_i32 = arith.constant 0 : i32
    %c0_i32_0 = arith.constant 0 : i32
    %c0_i32_1 = arith.constant 0 : i32
    return %c0_i32, %arg0, %c0_i32_0 : i32, i32, i32
  }
  func.func @transform_1(%arg0: i32) -> (i32, i32, i32) {
    %c0_i32 = arith.constant 0 : i32
    %c0_i32_0 = arith.constant 0 : i32
    %c0_i32_1 = arith.constant 0 : i32
    return %c0_i32, %arg0, %c0_i32_0 : i32, i32, i32
  }
  func.func @transform_2(%arg0: i32) -> (i32, i32) {
    %c0_i32 = arith.constant 0 : i32
    %c0_i32_0 = arith.constant 0 : i32
    return %arg0, %c0_i32 : i32, i32
  }
  func.func @transform_3(%arg0: i32) -> (i32, i32) {
    %c0_i32 = arith.constant 0 : i32
    %c0_i32_0 = arith.constant 0 : i32
    return %arg0, %c0_i32 : i32, i32
  }
  func.func @transform_4(%arg0: i32) -> (i32, i32, i32) {
    %c0_i32 = arith.constant 0 : i32
    %c0_i32_0 = arith.constant 0 : i32
    %c0_i32_1 = arith.constant 0 : i32
    return %c0_i32, %arg0, %c0_i32_0 : i32, i32, i32
  }
  func.func @transform_5(%arg0: i32) -> (i32, i32, i32) {
    %c0_i32 = arith.constant 0 : i32
    %c0_i32_0 = arith.constant 0 : i32
    %c0_i32_1 = arith.constant 0 : i32
    return %c0_i32, %arg0, %c0_i32_0 : i32, i32, i32
  }
  func.func @transform_6(%arg0: i32) -> (i32, i32, i32) {
    %c0_i32 = arith.constant 0 : i32
    %c0_i32_0 = arith.constant 0 : i32
    %c0_i32_1 = arith.constant 0 : i32
    return %c0_i32, %arg0, %c0_i32_0 : i32, i32, i32
  }
}

</mosaic_0001>

<bundles_post_ra>
// kernel: tpu_custom_call.1
= control target key start
LH: loop header
LB: loop body
LE: loop exit
PB: predicated region body
PF: predicated region fallthrough
CT: control target
= control target key end

     0   :  { %s2497_s0 = inlined_call_operand.hbm [shape: f32[3,128,128], index: 0, kind: input, shape index: {}]   ;;  %s2498_s1 = inlined_call_operand.hbm [shape: f32[3,128,128], index: 1, kind: input, shape index: {}]   ;;  %s2499_s2 = inlined_call_operand.hbm [shape: f32[128,128], index: 2, kind: input, shape index: {}]   ;;  %s2500_s3 = inlined_call_operand.hbm [shape: f32[128,128], index: 3, kind: input, shape index: {}]   ;;  %s2501_s4 = inlined_call_operand.hbm [shape: f32[3,128,128], index: 4, kind: input, shape index: {}]   ;;  %s2502_s5 = inlined_call_operand.hbm [shape: f32[3,128,128], index: 5, kind: output, shape index: {0}]   ;;  %s2503_s6 = inlined_call_operand.hbm [shape: f32[3,128,128], index: 6, kind: output, shape index: {1}]  }
   0x1   :  { %2508 = sst [smem:[#allocation35_spill]] %s2497_s0 }
   0x2   :  { %2509 = sst [smem:[#allocation36_spill]] %s2498_s1 }
   0x3   :  { %12 = vsyncpa [#allocation3], 0 }
   0x4   :  { %14 = vsyncpa [#allocation3 + $0x1], 0 }
   0x5   :  { %15 = vsyncpa [#allocation6], 0 }
   0x6   :  { %17 = vsyncpa [#allocation6 + $0x1], 0 }
   0x7   :  { %18 = vsyncpa [#allocation9], 0 }
   0x8   :  { %20 = vsyncpa [#allocation9 + $0x1], 0 }
   0x9   :  { %21 = vsyncpa [#allocation4], 0 }
   0xa   :  { %23 = vsyncpa [#allocation4 + $0x1], 0 }
   0xb   :  { %24 = vsyncpa [#allocation13], 0 }
   0xc   :  { %26 = vsyncpa [#allocation13 + $0x1], 0  ;;  %s1734_s21 = smov 0   ;;  %s1736_s22 = smov 0  }
   0xd   :  { %s1738_s23 = smov 0   ;;  %s1740_s24 = smov 0  }
   0xe LB: > { %2510 = sst [smem:[#allocation32_spill]] %s1658_s23  ;;  %s1755_s25 = sadd.s32 4294967295, %s1662_s24   ;;  %s1662_s24 = sphi %s1740_s24, %s2580_s24   ;;  %s1658_s23 = sphi %s1738_s23, %s2582_s23   ;;  %s1654_s22 = sphi %s1736_s22, %s2584_s22   ;;  %s1650_s21 = sphi %s1734_s21, %s2583_s21  }
   0xf   : > { %s1321_s26 = sadd.s32 4294967294, %s1662_s24   ;;  %s1759_s27 = sadd.s32 1, %s1662_s24  }
  0x10   : > { %2511 = sst [smem:[#allocation33_spill]] %s1759_s27  ;;  %s39_s28 = sadd.s32 1, %s1658_s23 }
  0x11   : > { %s36_s29 = ssub.s32 %s1662_s24, %s1759_s27  ;;  %p46_p0 = scmp.ne.s32.totalorder %s1658_s23, %s1654_s22 }
  0x12   : > { %p37_p1 = scmp.eq.s32.totalorder %s36_s29, 0  ;;  %p47_p2 = scmp.eq.s32.totalorder %s1662_s24, 0 }
  0x13   : > { %p52_p3 = scmp.ne.s32.totalorder %s1654_s22, %s1650_s21  ;;  %p53_p4 = scmp.eq.s32.totalorder %s1755_s25, 0 }
  0x14   : > { %s1771_s30 = scalar_select %p37_p1, %s1658_s23, %s39_s28  }
  0x15   : > { %p1773_p5 = por %p47_p2, %p46_p0  ;;  %p1777_p6 = por %p53_p4, %p52_p3 }
  0x16   : > { %2512 = sst [smem:[#allocation34_spill]] %s1771_s30  ;;  %p180_p7 = scmp.eq.s32.totalorder %s1755_s25, 3 }
  0x17   : > { %p186_p8 = scmp.eq.s32.totalorder %s1321_s26, 3  ;;  %p1323_p11 = scmp.ge.s32.totalorder %s1662_s24, 4 }
  0x18   : > { %p1782_p9 = por %p180_p7, %p46_p0 }
  0x19   : > { %p1786_p10 = por %p186_p8, %p52_p3  ;;  %228 = sbr.rel (%p1323_p11) target bundleno = 98 (0x62), region = 16 }
  0x1e   : > { %s1792_s11 = sand.u32 1, %s1658_s23   ;;  %s1795_s12 = sshll.u32 %s1662_s24, 5 }
  0x1f   : > { %s1798_s13 = smul.u32 96, %s1792_s11  ;;  %s2517_s0 = sld [smem:[#allocation35_spill]] }
  0x20   : > { %s1402_s18 = scalar_select %p1773_p5, [#allocation0], [#allocation24] }
  0x21   : > { %s236_s19 = scalar_lea.vmem [#allocation2], %s1798_s13  ;;  %s1664_s28 = smov 2048  }
  0x22   : > { %s256_s20 = sshll.u32 %s236_s19, 4  ;;  %s246_s26 = sld [smem:[%s1402_s18]]   ;;  %s257_s20 = int_to_ptr.vmem [resolvable:$true] %s256_s20 }
  0x23   : > { %1403 = sst [smem:[#allocation15]] (%p1773_p5), %s1664_s28  ;;  %s1665_s29 = smov 512  }
  0x24   : > { %1404 = sst [smem:[#allocation15 + $0x1]] (%p1773_p5), %s1665_s29  ;;  %s1666_s14 = smov 4  }
  0x25   : > { %s241_s16 = scalar_lea.hbm %s2517_s0, %s1795_s12  ;;  %1405 = sst [smem:[#allocation15 + $0x2]] (%p1773_p5), %s1666_s14 }
  0x26   : > { %s254_s17 = sshll.u32 %s241_s16, 4  ;;  %s1667_s15 = smov 128   ;;  %s255_s17 = int_to_ptr.hbm [resolvable:$true] %s254_s17 }
  0x27   : > { %1406 = sst [smem:[#allocation15 + $0x3]] (%p1773_p5), %s1667_s15  ;;  %s1668_s19 = smov 8  }
  0x28   : > { %1407 = sst [smem:[#allocation15 + $0x4]] (%p1773_p5), %s1667_s15  ;;  %s1326_s16 = sshll.u32 %s246_s26, 26 }
  0x29   : > { %1408 = sst [smem:[#allocation15 + $0x5]] (%p1773_p5), %s1668_s19  ;;  %s1327_s18 = sadd.s32 134217728, %s1326_s16 }
  0x2a   : > { %s233_s0 = scalar_lea.sflag [#allocation3], %s1792_s11  ;;  %s1669_s30 = smov [#allocation14]  }
  0x2b   : > { %1409 = dma.general (%p1773_p5), %s255_s17, 1536, %s257_s20, %s233_s0, %s1669_s30, [#allocation15], %s1327_s18, 0  }
  0x2c   : > { %s2507_s28 = sand.u32 1, %s1662_s24   ;;  %s2518_s1 = sld [smem:[#allocation36_spill]] }
  0x2d   : > { %s1410_s15 = scalar_select %p1773_p5, [#allocation0], [#allocation25] }
  0x2e   : > { %s283_s19 = scalar_lea.vmem [#allocation5], %s1798_s13  ;;  %s1670_s30 = smov 2048  }
  0x2f   : > { %s303_s23 = sshll.u32 %s283_s19, 4  ;;  %s293_s0 = sld [smem:[%s1410_s15]]   ;;  %s304_s23 = int_to_ptr.vmem [resolvable:$true] %s303_s23 }
  0x30   : > { %1411 = sst [smem:[#allocation17]] (%p1773_p5), %s1670_s30  ;;  %s1671_s17 = smov 512  }
  0x31   : > { %1412 = sst [smem:[#allocation17 + $0x1]] (%p1773_p5), %s1671_s17  ;;  %s1672_s20 = smov 4  }
  0x32   : > { %s288_s26 = scalar_lea.hbm %s2518_s1, %s1795_s12  ;;  %1413 = sst [smem:[#allocation17 + $0x2]] (%p1773_p5), %s1672_s20 }
  0x33   : > { %s301_s16 = sshll.u32 %s288_s26, 4  ;;  %s1673_s18 = smov 128   ;;  %s302_s16 = int_to_ptr.hbm [resolvable:$true] %s301_s16 }
  0x34   : > { %1414 = sst [smem:[#allocation17 + $0x3]] (%p1773_p5), %s1673_s18  ;;  %s1674_s26 = smov 8  }
  0x35   : > { %s1330_s29 = sshll.u32 %s293_s0, 26  ;;  %1415 = sst [smem:[#allocation17 + $0x4]] (%p1773_p5), %s1673_s18 }
  0x36   : > { %s1331_s14 = sadd.s32 134217728, %s1330_s29  ;;  %1416 = sst [smem:[#allocation17 + $0x5]] (%p1773_p5), %s1674_s26 }
  0x37   : > { %s280_s15 = scalar_lea.sflag [#allocation6], %s2507_s28  ;;  %s1675_s19 = smov [#allocation16]  }
  0x38   : > { %1417 = dma.general (%p1773_p5), %s302_s16, 1536, %s304_s23, %s280_s15, %s1675_s19, [#allocation17], %s1331_s14, 0  }
  0x39   : > { %s1332_s30 = sshll.u32 %s1792_s11, 5  ;;  %s335_s1 = scalar_lea.hbm %s2499_s2, %s1795_s12 }
  0x3a   : > { %s336_s0 = sshll.u32 %s335_s1, 4  ;;  %s330_s18 = scalar_lea.vmem [#allocation7], %s1332_s30  ;;  %s337_s0 = int_to_ptr.hbm [resolvable:$true] %s336_s0 }
  0x3b   : > { %s338_s29 = sshll.u32 %s330_s18, 4  ;;  %s1556_s27 = sshra.s32 %s337_s0, 4  ;;  %s339_s29 = int_to_ptr.vmem [resolvable:$true] %s338_s29  ;;  %s1557_s27 = int_to_ptr.hbm [resolvable:$true] %s1556_s27 }
  0x3c   : > { %s1558_s26 = scalar_lea.hbm %s1557_s27, 32  ;;  %s1562_s11 = scalar_lea.hbm %s2499_s2, 128 }
  0x3d   : > { %p1559_p12 = scmp.ne.s32.totalorder %s1557_s27, %s1558_s26  ;;  %p1563_p1 = scmp.lt.s32.totalorder %s1557_s27, %s2499_s2 }
  0x3e   : > { %p1564_p2 = scmp.lt.s32.totalorder %s1562_s11, %s1558_s26 }
  0x3f   : > { %p1560_p13 = pnand %p1559_p12, %p1773_p5 }
  0x40   : > { %p1565_p3 = por %p1564_p2, %p1563_p1 }
  0x41   : > { %p1561_p0 = pneg %p1560_p13 }
  0x43   : > { %p1566_p4 = pnand %p1565_p3, %p1561_p0 }
  0x45   : > { %1569 = shalt.err (!%p1566_p4)
}
  0x46   : > { %s1676_s1 = smov 128   ;;  %s1677_s17 = smov 8  }
  0x47   : > { %1418 = dma.hbm_to_vmem [thread:$0]  (%p1773_p5), %s337_s0, 512, %s339_s29, %s280_s15, %s1676_s1, %s1676_s1, %s1677_s17  }
  0x48   : > { %s357_s23 = scalar_lea.hbm %s2500_s3, %s1795_s12  ;;  %s352_s28 = scalar_lea.vmem [#allocation8], %s1332_s30 }
  0x49   : > { %s358_s16 = sshll.u32 %s357_s23, 4  ;;  %s360_s14 = sshll.u32 %s352_s28, 4  ;;  %s359_s16 = int_to_ptr.hbm [resolvable:$true] %s358_s16  ;;  %s361_s14 = int_to_ptr.vmem [resolvable:$true] %s360_s14 }
  0x4a   : > { %s2519_s27 = sand.u32 1, %s1662_s24   ;;  %s1584_s11 = sshra.s32 %s359_s16, 4  ;;  %s1585_s11 = int_to_ptr.hbm [resolvable:$true] %s1584_s11 }
  0x4b   : > { %s1867_s26 = scalar_lea.sflag [#allocation9], %s2519_s27  ;;  %s1586_s19 = scalar_lea.hbm %s1585_s11, 32 }
  0x4c   : > { %p1587_p7 = scmp.ne.s32.totalorder %s1585_s11, %s1586_s19  ;;  %s1590_s29 = scalar_lea.hbm %s2500_s3, 128 }
  0x4d   : > { %p1591_p12 = scmp.lt.s32.totalorder %s1585_s11, %s2500_s3  ;;  %p1592_p13 = scmp.lt.s32.totalorder %s1590_s29, %s1586_s19 }
  0x4e   : > { %p1588_p8 = pnand %p1587_p7, %p1773_p5 }
  0x4f   : > { %p1593_p0 = por %p1592_p13, %p1591_p12 }
  0x50   : > { %p1589_p11 = pneg %p1588_p8 }
  0x52   : > { %p1594_p1 = pnand %p1593_p0, %p1589_p11 }
  0x54   : > { %1597 = shalt.err (!%p1594_p1)
}
  0x55   : > { %1419 = dma.hbm_to_vmem [thread:$0]  (%p1773_p5), %s359_s16, 512, %s361_s14, %s1867_s26, %s1676_s1, %s1676_s1, %s1677_s17  }
  0x56   : > { %s379_s23 = scalar_lea.hbm %s2501_s4, %s1795_s12  ;;  %s374_s19 = scalar_lea.vmem [#allocation10], %s1798_s13 }
  0x57   : > { %s1420_s27 = scalar_select %p1773_p5, [#allocation0], [#allocation26] }
  0x58   : > { %s392_s11 = sshll.u32 %s379_s23, 4  ;;  %s394_s15 = sshll.u32 %s374_s19, 4  ;;  %s393_s11 = int_to_ptr.hbm [resolvable:$true] %s392_s11  ;;  %s395_s15 = int_to_ptr.vmem [resolvable:$true] %s394_s15 }
  0x59   : > { %s384_s0 = sld [smem:[%s1420_s27]]   ;;  %s1678_s1 = smov 2048  }
  0x5a   : > { %1421 = sst [smem:[#allocation19]] (%p1773_p5), %s1678_s1  ;;  %s1679_s17 = smov 512  }
  0x5b   : > { %1422 = sst [smem:[#allocation19 + $0x1]] (%p1773_p5), %s1679_s17  ;;  %s1680_s16 = smov 4  }
  0x5c   : > { %1423 = sst [smem:[#allocation19 + $0x2]] (%p1773_p5), %s1680_s16  ;;  %s1681_s12 = smov 128  }
  0x5d   : > { %1424 = sst [smem:[#allocation19 + $0x3]] (%p1773_p5), %s1681_s12  ;;  %s1682_s29 = smov 8  }
  0x5e   : > { %1425 = sst [smem:[#allocation19 + $0x4]] (%p1773_p5), %s1681_s12  ;;  %s1683_s20 = smov [#allocation18]  }
  0x5f   : > { %s1340_s13 = sshll.u32 %s384_s0, 26  ;;  %1426 = sst [smem:[#allocation19 + $0x5]] (%p1773_p5), %s1682_s29 }
  0x60   : > { %s1341_s14 = sadd.s32 134217728, %s1340_s13 }
  0x61   : > { %1427 = dma.general (%p1773_p5), %s393_s11, 1536, %s395_s15, %s1867_s26, %s1683_s20, [#allocation19], %s1341_s14, 0  }
  0x62 PF: > { %p1342_p2 = scmp.ge.s32.totalorder %s1662_s24, 1  ;;  %p415_p3 = scmp.lt.s32.totalorder %s1662_s24, 5 }
  0x64   : > { %p416_p4 = pnand %p1342_p2, %p415_p3 }
  0x65   : > { %s1905_s18 = sand.u32 (!%p416_p4), 1, %s1654_s22  }
  0x66   : > { %419 = sbr.rel (%p416_p4) target bundleno = 255 (0xff), region = 40  ;;  %s422_s30 = scalar_lea.sflag (!%p416_p4), [#allocation3], %s1905_s18 }
  0x67   : > { %s1908_s28 = smul.u32 (!%p416_p4), 96, %s1905_s18 }
  0x69   : > { %s1912_s23 = scalar_lea.vmem (!%p416_p4), [#allocation2], %s1908_s28 }
  0x6b   : > { %1629 = dma.done.wait (%p1777_p6), %s422_s30, 1536  }
  0x6c   : > { %1631 = vsyncadd (%p1777_p6), %s422_s30, 4294965760  ;;  %s431_s7 = sand.u32 1, %s1755_s25   ;;  %s1920_s27 = scalar_lea.vmem [#allocation5], %s1908_s28 }
  0x6d   : > { %s432_s26 = scalar_lea.sflag [#allocation6], %s431_s7 }
  0x6e   : > { %1633 = dma.done.wait (%p1777_p6), %s432_s26, 2048  }
  0x6f   : > { %1635 = vsyncadd (%p1777_p6), %s432_s26, 4294965248  ;;  %s1343_s11 = sshll.u32 %s1905_s18, 5  ;;  %s452_s15 = scalar_lea.sflag [#allocation9], %s431_s7 }
  0x70   : > { %s1927_s19 = scalar_lea.vmem [#allocation7], %s1343_s11  ;;  %s1929_s0 = scalar_lea.vmem [#allocation8], %s1343_s11 }
  0x71   : > { %1637 = dma.done.wait (%p1777_p6), %s452_s15, 2048  }
  0x72   : > { %1639 = vsyncadd (%p1777_p6), %s452_s15, 4294965248  ;;  %v531_v0 = vld [vmem:[%s1920_s27] sm:$0xff]  ;;  %v1684_v4 = vmov -1e-15   ;;  %v532_v14 = vld [vmem:[%s1920_s27 + $0x8] sm:$0xff]  ;;  %s2126_s8 = scalar_lea.vmem [#allocation11], %s1908_s28 }
  0x73   : > { %v1937_v1 = vld [vmem:[%s1912_s23] sm:$0xff]  ;;  %v535_v2 = vand.u32 2147483647, %v531_v0  ;;  %vm543_vm0 = vcmp.ge.f32.partialorder %v531_v0, 0.0  ;;  %v536_v17 = vand.u32 2147483647, %v532_v14 }
  0x74   : > { %v1349_v3 = vld [vmem:[%s1920_s27 + $0x20] sm:$0xff]  ;;  %v547_v5 = vsel %vm543_vm0, 1e-15, %v1684_v4  ;;  %v615_v11 = vsub.f32 -1.0, %v1937_v1  ;;  %v623_v12 = vsub.f32 1.0, %v1937_v1  ;;  %vm544_vm6 = vcmp.ge.f32.partialorder %v532_v14, 0.0 }
  0x75   : > { %v1942_v6 = vld [vmem:[%s1912_s23 + $0x20] sm:$0xff]  ;;  %v649_v7 = vand.u32 2147483647, %v1349_v3  ;;  %vm657_vm1 = vcmp.ge.f32.partialorder %v1349_v3, 0.0  ;;  %vm539_vm2 = vcmp.lt.f32.partialorder %v535_v2, 1e-15 }
  0x76   : > { %v661_v8 = vsel %vm657_vm1, 1e-15, %v1684_v4  ;;  %v551_v9 = vsel %vm539_vm2, %v547_v5, %v531_v0  ;;  %v1357_v10 = vld [vmem:[%s1920_s27 + $0x40] sm:$0xff]  ;;  %v729_v13 = vsub.f32 -1.0, %v1942_v6  ;;  %v737_v20 = vsub.f32 1.0, %v1942_v6  ;;  %v1350_v35 = vld [vmem:[%s1920_s27 + $0x28] sm:$0xff] }
  0x77   : > { %vm653_vm3 = vcmp.lt.f32.partialorder %v649_v7, 1e-15  ;;  %1524 = vrcp.f32 %v551_v9  ;;  %v771_v16 = vand.u32 2147483647, %v1357_v10  ;;  %vm779_vm4 = vcmp.ge.f32.partialorder %v1357_v10, 0.0  ;;  %v1952_v21 = vld [vmem:[%s1912_s23 + $0x40] sm:$0xff] }
  0x78   : > { %v665_v15 = vsel %vm653_vm3, %v661_v8, %v1349_v3  ;;  %v564_v18 = vand.u32 2147483647, %v551_v9  ;;  %v566_v19 = vand.u32 2147483648, %v551_v9  ;;  %v783_v24 = vsel %vm779_vm4, 1e-15, %v1684_v4  ;;  %v1977_v43 = vld [vmem:[%s1912_s23 + $0x8] sm:$0xff] }
  0x79   : > { %1526 = vrcp.f32 %v665_v15  ;;  %v678_v22 = vand.u32 2147483647, %v665_v15  ;;  %v680_v23 = vand.u32 2147483648, %v665_v15  ;;  %vm775_vm5 = vcmp.lt.f32.partialorder %v771_v16, 1e-15  ;;  %v1358_v60 = vld [vmem:[%s1920_s27 + $0x48] sm:$0xff] }
  0x7a   : > { %vm540_vm7 = vcmp.lt.f32.partialorder %v536_v17, 1e-15  ;;  %v548_v25 = vsel %vm544_vm6, 1e-15, %v1684_v4  ;;  %v1956_v26 = vsel %vm775_vm5, %v783_v24, %v1357_v10  ;;  %v851_v27 = vsub.f32 -1.0, %v1952_v21  ;;  %v2012_v7 = vld [vmem:[%s1912_s23 + $0x28] sm:$0xff] }
  0x7b   : > { %v859_v28 = vsub.f32 1.0, %v1952_v21  ;;  %v1960_v29 = vsel %vm540_vm7, %v548_v25, %v532_v14  ;;  %vm560_vm8 = vweird.f32 %v551_v9  ;;  %vm1962_vm9 = vcmp.eq.f32.partialorder %v564_v18, 8.507059e+37  ;;  %v533_v37 = vld [vmem:[%s1920_s27 + $0x10] sm:$0xff]  ;;  %s2388_s1 = scalar_lea.vmem [#allocation10], %s1908_s28  ;;  %s2408_s17 = scalar_lea.vmem [#allocation12], %s1908_s28 }
  0x7c   : > { %1528 = vrcp.f32 %v1956_v26  ;;  %v802_v32 = vand.u32 2147483648, %v1956_v26  ;;  %v567_v34 = vor.u32 1.1754944e-38, %v566_v19  ;;  %vm674_vm10 = vweird.f32 %v665_v15  ;;  %v2137_v24 = vld [vmem:[%s1912_s23 + $0x30] sm:$0xff]  ;;  %s1046_s16 = scalar_lea.sflag [#allocation4], %s1905_s18  ;;  %s1051_s12 = scalar_lea.sflag [#allocation13], %s1905_s18 }
  0x7d   : > { %v1525_v30 = vpop.eup %1524  ;;  %1530 = vrcp.f32 %v1960_v29  ;;  %vm1970_vm11 = vcmp.eq.f32.partialorder %v678_v22, 8.507059e+37  ;;  %v681_v38 = vor.u32 1.1754944e-38, %v680_v23  ;;  %v800_v39 = vand.u32 2147483647, %v1956_v26 }
  0x7e   : > { %v556_v33 = vmul.f32 %v1525_v30, %v551_v9  ;;  %v579_v40 = vand.u32 2147483647, %v1960_v29  ;;  %vm561_vm12 = vweird.f32 %v1525_v30  ;;  %v581_v44 = vand.u32 2147483648, %v1960_v29 }
  0x7f   : > { %v1527_v36 = vpop.eup %1526  ;;  %vm796_vm13 = vweird.f32 %v1956_v26  ;;  %v1981_v45 = vor.u32 1.1754944e-38, %v802_v32  ;;  %vm575_vm14 = vweird.f32 %v1960_v29  ;;  %v650_v46 = vand.u32 2147483647, %v1350_v35  ;;  %vm1985_vm1 = vmor %vm560_vm8, %vm561_vm12 }
  0x80   : > { %v557_v41 = vsub.f32 1.0, %v556_v33  ;;  %v670_v42 = vmul.f32 %v1527_v36, %v665_v15  ;;  %vm675_vm15 = vweird.f32 %v1527_v36  ;;  %vm658_vm0 = vcmp.ge.f32.partialorder %v1350_v35, 0.0 }
  0x81   : > { %vm1989_vm2 = vcmp.eq.f32.partialorder %v800_v39, 8.507059e+37  ;;  %vm1993_vm3 = vcmp.eq.f32.partialorder %v579_v40, 8.507059e+37  ;;  %v616_v53 = vsub.f32 -1.0, %v1977_v43  ;;  %vm654_vm4 = vcmp.lt.f32.partialorder %v650_v46, 1e-15  ;;  %vm2003_vm5 = vmor %vm674_vm10, %vm675_vm15  ;;  %v2065_v46 = vld [vmem:[%s1912_s23 + $0x48] sm:$0xff] }
  0x82   : > { %v558_v47 = vmul.f32 %v1525_v30, %v557_v41  ;;  %v671_v48 = vsub.f32 1.0, %v670_v42  ;;  %v1529_v49 = vpop.eup %1528  ;;  %v662_v54 = vsel %vm658_vm0, 1e-15, %v1684_v4  ;;  %v582_v59 = vor.u32 1.1754944e-38, %v581_v44 }
  0x83   : > { %v1531_v55 = vpop.eup %1530  ;;  %v792_v58 = vmul.f32 %v1529_v49, %v1956_v26  ;;  %vm797_vm6 = vweird.f32 %v1529_v49  ;;  %v624_v63 = vsub.f32 1.0, %v1977_v43  ;;  %v666_v0 = vsel %vm654_vm4, %v662_v54, %v1350_v35 }
  0x84   : > { %v559_v56 = vadd.f32 %v1525_v30, %v558_v47  ;;  %v672_v57 = vmul.f32 %v1527_v36, %v671_v48  ;;  %v571_v62 = vmul.f32 %v1531_v55, %v1960_v29  ;;  %1532 = vrcp.f32 %v666_v0  ;;  %vm2027_vm8 = vmor %vm796_vm13, %vm797_vm6 }
  0x85   : > { %v793_v5 = vsub.f32 1.0, %v792_v58  ;;  %vm576_vm7 = vweird.f32 %v1531_v55  ;;  %v772_v10 = vand.u32 2147483647, %v1358_v60  ;;  %v693_v31 = vand.u32 2147483647, %v666_v0  ;;  %v1351_v58 = vld [vmem:[%s1920_s27 + $0x30] sm:$0xff] }
  0x86   : > { %v563_v2 = vsel %vm1985_vm1, %v1525_v30, %v559_v56  ;;  %v673_v3 = vadd.f32 %v1527_v36, %v672_v57  ;;  %v572_v9 = vsub.f32 1.0, %v571_v62  ;;  %vm2038_vm10 = vmor %vm575_vm14, %vm576_vm7  ;;  %v738_v21 = vsub.f32 1.0, %v2012_v7 }
  0x87   : > { %v568_v8 = vsel %vm1962_vm9, %v567_v34, %v563_v2  ;;  %v794_v17 = vmul.f32 %v1529_v49, %v793_v5  ;;  %vm780_vm9 = vcmp.ge.f32.partialorder %v1358_v60, 0.0  ;;  %vm2042_vm12 = vcmp.lt.f32.partialorder %v772_v10, 1e-15 }
  0x88   : > { %v619_v14 = vmul.f32 %v615_v11, %v568_v8  ;;  %v627_v15 = vmul.f32 %v623_v12, %v568_v8  ;;  %v677_v16 = vsel %vm2003_vm5, %v1527_v36, %v673_v3  ;;  %v573_v22 = vmul.f32 %v1531_v55, %v572_v9 }
  0x89   : > { %v682_v18 = vsel %vm1970_vm11, %v681_v38, %v677_v16  ;;  %v730_v11 = vsub.f32 -1.0, %v2012_v7  ;;  %vm689_vm11 = vweird.f32 %v666_v0  ;;  %v795_v26 = vadd.f32 %v1529_v49, %v794_v17  ;;  %v1359_v7 = vld [vmem:[%s1920_s27 + $0x50] sm:$0xff] }
  0x8a   : > { %v631_v1 = vmin.f32 %v619_v14, %v627_v15  ;;  %v733_v12 = vmul.f32 %v729_v13, %v682_v18  ;;  %v741_v23 = vmul.f32 %v737_v20, %v682_v18  ;;  %v635_v25 = vmax.f32 %v619_v14, %v627_v15  ;;  %v1533_v32 = vpop.eup %1532  ;;  %v2115_v14 = vld [vmem:[%s1912_s23 + $0x10] sm:$0xff] }
  0x8b   : > { %v574_v30 = vadd.f32 %v1531_v55, %v573_v22  ;;  %v695_v13 = vand.u32 2147483648, %v666_v0  ;;  %v799_v20 = vsel %vm2027_vm8, %v1529_v49, %v795_v26  ;;  %v685_v35 = vmul.f32 %v1533_v32, %v666_v0 }
  0x8c   : > { %v745_v33 = vmin.f32 %v733_v12, %v741_v23  ;;  %v749_v34 = vmax.f32 %v733_v12, %v741_v23  ;;  %v784_v36 = vsel %vm780_vm9, 1e-15, %v1684_v4  ;;  %v804_v39 = vsel %vm1989_vm2, %v1981_v45, %v799_v20 }
  0x8d   : > { %v578_v29 = vsel %vm2038_vm10, %v1531_v55, %v574_v30  ;;  %vm690_vm13 = vweird.f32 %v1533_v32  ;;  %v855_v42 = vmul.f32 %v851_v27, %v804_v39  ;;  %v863_v43 = vmul.f32 %v859_v28, %v804_v39  ;;  %v534_v39 = vld [vmem:[%s1920_s27 + $0x18] sm:$0xff] }
  0x8e   : > { %v753_v38 = vmax.f32 %v631_v1, %v745_v33  ;;  %v583_v40 = vsel %vm1993_vm3, %v582_v59, %v578_v29  ;;  %v757_v41 = vmin.f32 %v635_v25, %v749_v34  ;;  %v686_v48 = vsub.f32 1.0, %v685_v35  ;;  %vm2086_vm15 = vmor %vm689_vm11, %vm690_vm13 }
  0x8f   : > { %v2062_v44 = vmul.f32 %v616_v53, %v583_v40  ;;  %v2067_v47 = vmul.f32 %v624_v63, %v583_v40  ;;  %v2071_v45 = vsel %vm2042_vm12, %v784_v36, %v1358_v60  ;;  %v537_v49 = vand.u32 2147483647, %v533_v37 }
  0x90   : > { %v867_v50 = vmin.f32 %v855_v42, %v863_v43  ;;  %v871_v51 = vmax.f32 %v855_v42, %v863_v43  ;;  %vm2073_vm14 = vcmp.eq.f32.partialorder %v693_v31, 8.507059e+37  ;;  %v687_v28 = vmul.f32 %v1533_v32, %v686_v48  ;;  %v2155_v43 = vld [vmem:[%s1912_s23 + $0x50] sm:$0xff] }
  0x91   : > { %v696_v52 = vor.u32 1.1754944e-38, %v695_v13  ;;  %1534 = vrcp.f32 %v2071_v45  ;;  %v852_v53 = vsub.f32 -1.0, %v2065_v46  ;;  %v860_v57 = vsub.f32 1.0, %v2065_v46 }
  0x92   : > { %v2080_v54 = vmax.f32 %v753_v38, %v867_v50  ;;  %v2082_v55 = vmin.f32 %v757_v41, %v871_v51  ;;  %vm541_vm0 = vcmp.lt.f32.partialorder %v537_v49, 1e-15  ;;  %v632_v59 = vmin.f32 %v2062_v44, %v2067_v47 }
  0x93   : > { %v688_v60 = vadd.f32 %v1533_v32, %v687_v28  ;;  %v815_v61 = vand.u32 2147483647, %v2071_v45  ;;  %vm545_vm1 = vcmp.ge.f32.partialorder %v533_v37, 0.0  ;;  %v636_v62 = vmax.f32 %v2062_v44, %v2067_v47 }
  0x94   : > { %vm883_vm2 = vcmp.gt.f32.partialorder %v2080_v54, %v2082_v55  ;;  %v817_v63 = vand.u32 2147483648, %v2071_v45  ;;  %v549_v0 = vsel %vm545_vm1, 1e-15, %v1684_v4  ;;  %v651_v8 = vand.u32 2147483647, %v1351_v58 }
  0x95   : > { %v887_v2 = vsel %vm883_vm2, 3.4028235e+38, %v2080_v54  ;;  %v692_v3 = vsel %vm2086_vm15, %v1533_v32, %v688_v60  ;;  %v2107_v5 = vsel %vm541_vm0, %v549_v0, %v533_v37  ;;  %vm811_vm3 = vweird.f32 %v2071_v45 }
  0x96   : > { %v2109_v9 = vmax.f32 %v887_v2, 0.2  ;;  %v697_v10 = vsel %vm2073_vm14, %v696_v52, %v692_v3  ;;  %1536 = vrcp.f32 %v2107_v5  ;;  %vm2120_vm4 = vcmp.eq.f32.partialorder %v815_v61, 8.507059e+37 }
  0x97   : > { %v1535_v15 = vpop.eup %1534  ;;  %v734_v16 = vmul.f32 %v730_v11, %v697_v10  ;;  %v742_v17 = vmul.f32 %v738_v21, %v697_v10  ;;  %v594_v19 = vand.u32 2147483647, %v2107_v5  ;;  %v596_v1 = vand.u32 2147483648, %v2107_v5 }
  0x98   : > { %899 = vst [vmem:[%s2126_s8] sm:$0xff] %v2109_v9  ;;  %v807_v22 = vmul.f32 %v1535_v15, %v2071_v45  ;;  %vm655_vm5 = vcmp.lt.f32.partialorder %v651_v8, 1e-15  ;;  %vm659_vm6 = vcmp.ge.f32.partialorder %v1351_v58, 0.0  ;;  %v818_v11 = vor.u32 1.1754944e-38, %v817_v63 }
  0x99   : > { %vm590_vm7 = vweird.f32 %v2107_v5  ;;  %v617_v12 = vsub.f32 -1.0, %v2115_v14  ;;  %v625_v23 = vsub.f32 1.0, %v2115_v14  ;;  %v746_v25 = vmin.f32 %v734_v16, %v742_v17 }
  0x9a   : > { %v808_v26 = vsub.f32 1.0, %v807_v22  ;;  %vm812_vm8 = vweird.f32 %v1535_v15  ;;  %v663_v30 = vsel %vm659_vm6, 1e-15, %v1684_v4  ;;  %v750_v31 = vmax.f32 %v734_v16, %v742_v17  ;;  %v2188_v16 = vld [vmem:[%s1912_s23 + $0x18] sm:$0xff] }
  0x9b   : > { %vm2140_vm9 = vcmp.eq.f32.partialorder %v594_v19, 8.507059e+37  ;;  %v667_v33 = vsel %vm655_vm5, %v663_v30, %v1351_v58  ;;  %v773_v34 = vand.u32 2147483647, %v1359_v7  ;;  %v597_v20 = vor.u32 1.1754944e-38, %v596_v1  ;;  %vm2147_vm10 = vmor %vm811_vm3, %vm812_vm8 }
  0x9c   : > { %v1537_v13 = vpop.eup %1536  ;;  %v809_v6 = vmul.f32 %v1535_v15, %v808_v26  ;;  %1538 = vrcp.f32 %v667_v33  ;;  %v731_v29 = vsub.f32 -1.0, %v2137_v24  ;;  %v708_v37 = vand.u32 2147483647, %v667_v33 }
  0x9d   : > { %v586_v36 = vmul.f32 %v1537_v13, %v2107_v5  ;;  %v739_v38 = vsub.f32 1.0, %v2137_v24  ;;  %vm777_vm11 = vcmp.lt.f32.partialorder %v773_v34, 1e-15  ;;  %v754_v40 = vmax.f32 %v632_v59, %v746_v25 }
  0x9e   : > { %v810_v41 = vadd.f32 %v1535_v15, %v809_v6  ;;  %v710_v42 = vand.u32 2147483648, %v667_v33  ;;  %vm781_vm12 = vcmp.ge.f32.partialorder %v1359_v7, 0.0  ;;  %v758_v44 = vmin.f32 %v636_v62, %v750_v31 }
  0x9f   : > { %v587_v47 = vsub.f32 1.0, %v586_v36  ;;  %vm591_vm13 = vweird.f32 %v1537_v13  ;;  %v785_v48 = vsel %vm781_vm12, 1e-15, %v1684_v4  ;;  %vm704_vm14 = vweird.f32 %v667_v33 }
  0xa0   : > { %v814_v45 = vsel %vm2147_vm10, %v1535_v15, %v810_v41  ;;  %v789_v49 = vsel %vm777_vm11, %v785_v48, %v1359_v7  ;;  %v538_v50 = vand.u32 2147483647, %v534_v39  ;;  %vm2162_vm15 = vcmp.eq.f32.partialorder %v708_v37, 8.507059e+37  ;;  %vm2173_vm0 = vmor %vm590_vm7, %vm591_vm13 }
  0xa1   : > { %v819_v51 = vsel %vm2120_vm4, %v818_v11, %v814_v45  ;;  %v588_v27 = vmul.f32 %v1537_v13, %v587_v47  ;;  %1540 = vrcp.f32 %v789_v49  ;;  %v853_v28 = vsub.f32 -1.0, %v2155_v43 }
  0xa2   : > { %v1539_v52 = vpop.eup %1538  ;;  %v856_v56 = vmul.f32 %v852_v53, %v819_v51  ;;  %v864_v58 = vmul.f32 %v860_v57, %v819_v51  ;;  %v711_v60 = vor.u32 1.1754944e-38, %v710_v42  ;;  %vm546_vm1 = vcmp.ge.f32.partialorder %v534_v39, 0.0 }
  0xa3   : > { %v589_v61 = vadd.f32 %v1537_v13, %v588_v27  ;;  %v700_v62 = vmul.f32 %v1539_v52, %v667_v33  ;;  %v861_v63 = vsub.f32 1.0, %v2155_v43  ;;  %vm542_vm3 = vcmp.lt.f32.partialorder %v538_v50, 1e-15  ;;  %v1360_v27 = vld [vmem:[%s1920_s27 + $0x58] sm:$0xff] }
  0xa4   : > { %v868_v0 = vmin.f32 %v856_v56, %v864_v58  ;;  %v872_v2 = vmax.f32 %v856_v56, %v864_v58  ;;  %v830_v53 = vand.u32 2147483647, %v789_v49  ;;  %v832_v3 = vand.u32 2147483648, %v789_v49 }
  0xa5   : > { %v593_v46 = vsel %vm2173_vm0, %v1537_v13, %v589_v61  ;;  %v701_v57 = vsub.f32 1.0, %v700_v62  ;;  %vm705_vm4 = vweird.f32 %v1539_v52  ;;  %v550_v5 = vsel %vm546_vm1, 1e-15, %v1684_v4 }
  0xa6   : > { %v2181_v8 = vmax.f32 %v754_v40, %v868_v0  ;;  %v2183_v10 = vmin.f32 %v758_v44, %v872_v2  ;;  %v598_v15 = vsel %vm2140_vm9, %v597_v20, %v593_v46  ;;  %v554_v17 = vsel %vm542_vm3, %v550_v5, %v534_v39  ;;  %vm2197_vm6 = vmor %vm704_vm14, %vm705_vm4  ;;  %v2244_v0 = vld [vmem:[%s1912_s23 + $0x38] sm:$0xff]  ;;  %v914_v2 = vld [vmem:[%s1929_s0 + $0x10] sm:$0xff] }
  0xa7   : > { %v1541_v18 = vpop.eup %1540  ;;  %v621_v19 = vmul.f32 %v617_v12, %v598_v15  ;;  %v629_v22 = vmul.f32 %v625_v23, %v598_v15  ;;  %v702_v1 = vmul.f32 %v1539_v52, %v701_v57  ;;  %1542 = vrcp.f32 %v554_v17  ;;  %v1352_v12 = vld [vmem:[%s1920_s27 + $0x38] sm:$0xff] }
  0xa8   : > { %vm884_vm5 = vcmp.gt.f32.partialorder %v2181_v8, %v2183_v10  ;;  %v822_v11 = vmul.f32 %v1541_v18, %v789_v49  ;;  %vm826_vm7 = vweird.f32 %v789_v49  ;;  %vm2201_vm8 = vcmp.eq.f32.partialorder %v830_v53, 8.507059e+37 }
  0xa9   : > { %v888_v14 = vsel %vm884_vm5, 3.4028235e+38, %v2181_v8  ;;  %v703_v23 = vadd.f32 %v1539_v52, %v702_v1  ;;  %v833_v26 = vor.u32 1.1754944e-38, %v832_v3  ;;  %v618_v30 = vsub.f32 -1.0, %v2188_v16 }
  0xaa   : > { %v2211_v31 = vmax.f32 %v888_v14, 0.2  ;;  %v823_v32 = vsub.f32 1.0, %v822_v11  ;;  %vm827_vm9 = vweird.f32 %v1541_v18  ;;  %vm605_vm10 = vweird.f32 %v554_v17  ;;  %v2267_v11 = vld [vmem:[%s1912_s23 + $0x58] sm:$0xff] }
  0xab   : > { %v633_v33 = vmin.f32 %v621_v19, %v629_v22  ;;  %v707_v34 = vsel %vm2197_vm6, %v1539_v52, %v703_v23  ;;  %v652_v13 = vand.u32 2147483647, %v1352_v12  ;;  %vm660_vm11 = vcmp.ge.f32.partialorder %v1352_v12, 0.0  ;;  %vm2224_vm12 = vmor %vm826_vm7, %vm827_vm9 }
  0xac   : > { %900 = vst [vmem:[%s2126_s8 + $0x8] sm:$0xff] %v2211_v31  ;;  %v712_v6 = vsel %vm2162_vm15, %v711_v60, %v707_v34  ;;  %v824_v20 = vmul.f32 %v1541_v18, %v823_v32  ;;  %v609_v35 = vand.u32 2147483647, %v554_v17  ;;  %v611_v36 = vand.u32 2147483648, %v554_v17 }
  0xad   : > { %v1543_v37 = vpop.eup %1542  ;;  %v735_v39 = vmul.f32 %v731_v29, %v712_v6  ;;  %v743_v40 = vmul.f32 %v739_v38, %v712_v6  ;;  %vm656_vm13 = vcmp.lt.f32.partialorder %v652_v13, 1e-15  ;;  %v664_v42 = vsel %vm660_vm11, 1e-15, %v1684_v4  ;;  %v912_v6 = vld [vmem:[%s1929_s0] sm:$0xff] }
  0xae   : > { %v637_v44 = vmax.f32 %v621_v19, %v629_v22  ;;  %v825_v47 = vadd.f32 %v1541_v18, %v824_v20  ;;  %v601_v48 = vmul.f32 %v1543_v37, %v554_v17  ;;  %v668_v45 = vsel %vm656_vm13, %v664_v42, %v1352_v12 }
  0xaf   : > { %v747_v50 = vmin.f32 %v735_v39, %v743_v40  ;;  %v751_v51 = vmax.f32 %v735_v39, %v743_v40  ;;  %v626_v29 = vsub.f32 1.0, %v2188_v16  ;;  %1544 = vrcp.f32 %v668_v45 }
  0xb0   : > { %v829_v24 = vsel %vm2224_vm12, %v1541_v18, %v825_v47  ;;  %v602_v38 = vsub.f32 1.0, %v601_v48  ;;  %vm606_vm14 = vweird.f32 %v1543_v37  ;;  %vm2232_vm15 = vcmp.eq.f32.partialorder %v609_v35, 8.507059e+37  ;;  %v913_v48 = vld [vmem:[%s1929_s0 + $0x8] sm:$0xff] }
  0xb1   : > { %v755_v21 = vmax.f32 %v633_v33, %v747_v50  ;;  %v834_v52 = vsel %vm2201_vm8, %v833_v26, %v829_v24  ;;  %v612_v56 = vor.u32 1.1754944e-38, %v611_v36  ;;  %v723_v58 = vand.u32 2147483647, %v668_v45  ;;  %vm2247_vm0 = vmor %vm605_vm10, %vm606_vm14 }
  0xb2   : > { %v759_v59 = vmin.f32 %v637_v44, %v751_v51  ;;  %v857_v60 = vmul.f32 %v853_v28, %v834_v52  ;;  %v865_v61 = vmul.f32 %v861_v63, %v834_v52  ;;  %v603_v62 = vmul.f32 %v1543_v37, %v602_v38 }
  0xb3   : > { %vm719_vm1 = vweird.f32 %v668_v45  ;;  %v725_v53 = vand.u32 2147483648, %v668_v45  ;;  %v774_v3 = vand.u32 2147483647, %v1360_v27  ;;  %vm782_vm3 = vcmp.ge.f32.partialorder %v1360_v27, 0.0 }
  0xb4   : > { %v869_v46 = vmin.f32 %v857_v60, %v865_v61  ;;  %v873_v57 = vmax.f32 %v857_v60, %v865_v61  ;;  %v604_v28 = vadd.f32 %v1543_v37, %v603_v62  ;;  %v786_v43 = vsel %vm782_vm3, 1e-15, %v1684_v4 }
  0xb5   : > { %v1545_v63 = vpop.eup %1544  ;;  %vm2252_vm4 = vcmp.eq.f32.partialorder %v723_v58, 8.507059e+37  ;;  %v732_v15 = vsub.f32 -1.0, %v2244_v0  ;;  %vm778_vm6 = vcmp.lt.f32.partialorder %v774_v3, 1e-15  ;;  %v891_v17 = vsel %vm883_vm2, 3.4028235e+38, %v2082_v55 }
  0xb6   : > { %v877_v18 = vmax.f32 %v755_v21, %v869_v46  ;;  %v881_v19 = vmin.f32 %v759_v59, %v873_v57  ;;  %v608_v22 = vsel %vm2247_vm0, %v1543_v37, %v604_v28  ;;  %v715_v1 = vmul.f32 %v1545_v63, %v668_v45  ;;  %1361 = vst [vmem:[%s2126_s8 + $0x20] sm:$0xff] %v891_v17 }
  0xb7   : > { %v613_v4 = vsel %vm2232_vm15, %v612_v56, %v608_v22  ;;  %v726_v7 = vor.u32 1.1754944e-38, %v725_v53  ;;  %v2269_v25 = vsel %vm778_vm6, %v786_v43, %v1360_v27  ;;  %v2272_v12 = vsub.f32 %v891_v17, %v2109_v9  ;;  %v1378_v22 = vld [vmem:[%s2388_s1 + $0x48] sm:$0xff] }
  0xb8   : > { %vm885_vm2 = vcmp.gt.f32.partialorder %v877_v18, %v881_v19  ;;  %v716_v54 = vsub.f32 1.0, %v715_v1  ;;  %vm720_vm7 = vweird.f32 %v1545_v63  ;;  %v740_v55 = vsub.f32 1.0, %v2244_v0 }
  0xb9   : > { %v889_v14 = vsel %vm885_vm2, 3.4028235e+38, %v877_v18  ;;  %v622_v23 = vmul.f32 %v618_v30, %v613_v4  ;;  %v630_v26 = vmul.f32 %v626_v29, %v613_v4  ;;  %1546 = vrcp.f32 %v2269_v25  ;;  %vm2285_vm8 = vmor %vm719_vm1, %vm720_vm7  ;;  %v1377_v18 = vld [vmem:[%s2388_s1 + $0x40] sm:$0xff] }
  0xba   : > { %v2279_v32 = vmax.f32 %v889_v14, 0.2  ;;  %v717_v33 = vmul.f32 %v1545_v63, %v716_v54  ;;  %v845_v34 = vand.u32 2147483647, %v2269_v25  ;;  %v854_v13 = vsub.f32 -1.0, %v2267_v11 }
  0xbb   : > { %v847_v16 = vand.u32 2147483648, %v2269_v25  ;;  %v862_v30 = vsub.f32 1.0, %v2267_v11  ;;  %1548 = vrcp.f32 %v2272_v12  ;;  %v892_v35 = vsel %vm884_vm5, 3.4028235e+38, %v2183_v10 }
  0xbc   : > { %901 = vst [vmem:[%s2126_s8 + $0x10] sm:$0xff] %v2279_v32  ;;  %v718_v36 = vadd.f32 %v1545_v63, %v717_v33  ;;  %vm841_vm9 = vweird.f32 %v2269_v25  ;;  %v2300_v37 = vsub.f32 %v892_v35, %v2211_v31  ;;  %v893_v39 = vsel %vm885_vm2, 3.4028235e+38, %v881_v19  ;;  %v908_v33 = vld [vmem:[%s1927_s19] sm:$0xff] }
  0xbd   : > { %v634_v40 = vmin.f32 %v622_v23, %v630_v26  ;;  %v638_v41 = vmax.f32 %v622_v23, %v630_v26  ;;  %1362 = vst [vmem:[%s2126_s8 + $0x28] sm:$0xff] %v892_v35  ;;  %v2305_v42 = vsub.f32 %v893_v39, %v2279_v32  ;;  %v924_v8 = vsub.f32 %v912_v6, %v2109_v9 }
  0xbe   : > { %v722_v10 = vsel %vm2285_vm8, %v1545_v63, %v718_v36  ;;  %vm2310_vm5 = vcmp.eq.f32.partialorder %v845_v34, 8.507059e+37  ;;  %1550 = vrcp.f32 %v2300_v37  ;;  %1363 = vst [vmem:[%s2126_s8 + $0x30] sm:$0xff] %v893_v39  ;;  %v941_v47 = vand.u32 2147483647, %v2272_v12  ;;  %v909_v36 = vld [vmem:[%s1927_s19 + $0x8] sm:$0xff] }
  0xbf   : > { %v1547_v45 = vpop.eup %1546  ;;  %v727_v50 = vsel %vm2252_vm4, %v726_v7, %v722_v10  ;;  %v848_v51 = vor.u32 1.1754944e-38, %v847_v16  ;;  %1552 = vrcp.f32 %v2305_v42  ;;  %v943_v9 = vand.u32 2147483648, %v2272_v12 }
  0xc0   : > { %v736_v29 = vmul.f32 %v732_v15, %v727_v50  ;;  %v744_v24 = vmul.f32 %v740_v55, %v727_v50  ;;  %v837_v38 = vmul.f32 %v1547_v45, %v2269_v25  ;;  %vm937_vm10 = vweird.f32 %v2272_v12 }
  0xc1   : > { %v1549_v49 = vpop.eup %1548  ;;  %vm842_vm11 = vweird.f32 %v1547_v45  ;;  %v928_v27 = vmax.f32 %v924_v8, 0.0  ;;  %vm2324_vm12 = vcmp.eq.f32.partialorder %v941_v47, 8.507059e+37  ;;  %v925_v52 = vsub.f32 %v913_v48, %v2211_v31  ;;  %v1005_v47 = vld [vmem:[%s2388_s1] sm:$0xff]  ;;  %v910_v48 = vld [vmem:[%s1927_s19 + $0x10] sm:$0xff] }
  0xc2   : > { %v748_v56 = vmin.f32 %v736_v29, %v744_v24  ;;  %v752_v58 = vmax.f32 %v736_v29, %v744_v24  ;;  %v838_v59 = vsub.f32 1.0, %v837_v38  ;;  %v933_v60 = vmul.f32 %v1549_v49, %v2272_v12  ;;  %vm2338_vm0 = vmor %vm841_vm9, %vm842_vm11 }
  0xc3   : > { %vm920_vm13 = vcmp.gt.f32.partialorder %v2272_v12, 0.0  ;;  %v944_v61 = vor.u32 1.1754944e-38, %v943_v9  ;;  %vm952_vm14 = vweird.f32 %v2300_v37  ;;  %v956_v62 = vand.u32 2147483647, %v2300_v37  ;;  %v911_v9 = vld [vmem:[%s1927_s19 + $0x18] sm:$0xff] }
  0xc4   : > { %v958_v0 = vand.u32 2147483648, %v2300_v37  ;;  %v1551_v53 = vpop.eup %1550  ;;  %v839_v3 = vmul.f32 %v1547_v45, %v838_v59  ;;  %v934_v46 = vsub.f32 1.0, %v933_v60  ;;  %vm938_vm15 = vweird.f32 %v1549_v49  ;;  %v1007_v59 = vld [vmem:[%s2388_s1 + $0x10] sm:$0xff] }
  0xc5   : > { %v929_v31 = vmax.f32 %v925_v52, 0.0  ;;  %v1553_v57 = vpop.eup %1552  ;;  %v756_v28 = vmax.f32 %v634_v40, %v748_v56  ;;  %v760_v43 = vmin.f32 %v638_v41, %v752_v58  ;;  %v948_v5 = vmul.f32 %v1551_v53, %v2300_v37  ;;  %vm2351_vm6 = vmor %vm937_vm10, %vm938_vm15  ;;  %v1006_v56 = vld [vmem:[%s2388_s1 + $0x8] sm:$0xff] }
  0xc6   : > { %vm953_vm1 = vweird.f32 %v1551_v53  ;;  %v840_v15 = vadd.f32 %v1547_v45, %v839_v3  ;;  %v935_v17 = vmul.f32 %v1549_v49, %v934_v46  ;;  %vm921_vm3 = vcmp.gt.f32.partialorder %v2300_v37, 0.0 }
  0xc7   : > { %vm2344_vm4 = vcmp.eq.f32.partialorder %v956_v62, 8.507059e+37  ;;  %v926_v19 = vsub.f32 %v914_v2, %v2279_v32  ;;  %v949_v1 = vsub.f32 1.0, %v948_v5  ;;  %v959_v4 = vor.u32 1.1754944e-38, %v958_v0  ;;  %vm2373_vm8 = vmor %vm952_vm14, %vm953_vm1  ;;  %v1371_v5 = vld [vmem:[%s2388_s1 + $0x30] sm:$0xff] }
  0xc8   : > { %v963_v7 = vmul.f32 %v1553_v57, %v2305_v42  ;;  %vm967_vm2 = vweird.f32 %v2305_v42  ;;  %v844_v25 = vsel %vm2338_vm0, %v1547_v45, %v840_v15  ;;  %v936_v54 = vadd.f32 %v1549_v49, %v935_v17  ;;  %v1372_v17 = vld [vmem:[%s2388_s1 + $0x38] sm:$0xff] }
  0xc9   : > { %vm968_vm7 = vweird.f32 %v1553_v57  ;;  %v971_v55 = vand.u32 2147483647, %v2305_v42  ;;  %v849_v14 = vsel %vm2310_vm5, %v848_v51, %v844_v25  ;;  %v950_v23 = vmul.f32 %v1551_v53, %v949_v1  ;;  %v1380_v25 = vld [vmem:[%s2388_s1 + $0x58] sm:$0xff] }
  0xca   : > { %v964_v26 = vsub.f32 1.0, %v963_v7  ;;  %v973_v32 = vand.u32 2147483648, %v2305_v42  ;;  %v858_v34 = vmul.f32 %v854_v13, %v849_v14  ;;  %v866_v6 = vmul.f32 %v862_v30, %v849_v14  ;;  %vm2383_vm9 = vmor %vm967_vm2, %vm968_vm7 }
  0xcb   : > { %v940_v20 = vsel %vm2351_vm6, %v1549_v49, %v936_v54  ;;  %v930_v35 = vmax.f32 %v926_v19, 0.0  ;;  %v951_v13 = vadd.f32 %v1551_v53, %v950_v23  ;;  %v1001_v44 = vsub.f32 1.0, %v908_v33 }
  0xcc   : > { %v945_v39 = vsel %vm2324_vm12, %v944_v61, %v940_v20  ;;  %v965_v11 = vmul.f32 %v1553_v57, %v964_v26  ;;  %v974_v30 = vor.u32 1.1754944e-38, %v973_v32  ;;  %v870_v40 = vmin.f32 %v858_v34, %v866_v6 }
  0xcd   : > { %v874_v41 = vmax.f32 %v858_v34, %v866_v6  ;;  %v946_v8 = vmul.f32 %v945_v39, %v928_v27  ;;  %v955_v45 = vsel %vm2373_vm8, %v1551_v53, %v951_v13  ;;  %vm972_vm5 = vcmp.eq.f32.partialorder %v971_v55, 8.507059e+37  ;;  %v1008_v53 = vld [vmem:[%s2388_s1 + $0x18] sm:$0xff] }
  0xce   : > { %v966_v50 = vadd.f32 %v1553_v57, %v965_v11  ;;  %v1002_v51 = vsub.f32 1.0, %v909_v36  ;;  %v878_v29 = vmax.f32 %v756_v28, %v870_v40  ;;  %v960_v49 = vsel %vm2344_vm4, %v959_v4, %v955_v45  ;;  %v1370_v28 = vld [vmem:[%s2388_s1 + $0x28] sm:$0xff]  ;;  %v1379_v4 = vld [vmem:[%s2388_s1 + $0x50] sm:$0xff]  ;;  %v915_v55 = vld [vmem:[%s1929_s0 + $0x18] sm:$0xff] }
  0xcf   : > { %v882_v24 = vmin.f32 %v760_v43, %v874_v41  ;;  %v992_v38 = vsel %vm920_vm13, %v946_v8, 0.0  ;;  %v961_v27 = vmul.f32 %v960_v49, %v929_v31  ;;  %v1009_v52 = vadd.f32 %v1005_v47, %v1001_v44  ;;  %v1369_v31 = vld [vmem:[%s2388_s1 + $0x20] sm:$0xff] }
  0xd0   : > { %1365 = vst [vmem:[%s2126_s8 + $0x40] sm:$0xff] %v992_v38  ;;  %v970_v21 = vsel %vm2383_vm9, %v1553_v57, %v966_v50  ;;  %v1003_v58 = vsub.f32 1.0, %v910_v48  ;;  %vm922_vm11 = vcmp.gt.f32.partialorder %v2305_v42, 0.0  ;;  %v1004_v60 = vsub.f32 1.0, %v911_v9 }
  0xd1   : > { %vm886_vm10 = vcmp.gt.f32.partialorder %v878_v29, %v882_v24  ;;  %v975_v12 = vsel %vm972_vm5, %v974_v30, %v970_v21  ;;  %v993_v0 = vsel %vm921_vm3, %v961_v27, 0.0  ;;  %1013 = vst [vmem:[%s2408_s17] sm:$0xff] %v1009_v52  ;;  %v1010_v46 = vadd.f32 %v1006_v56, %v1002_v51 }
  0xd2   : > { %v890_v61 = vsel %vm886_vm10, 3.4028235e+38, %v878_v29  ;;  %v894_v62 = vsel %vm886_vm10, 3.4028235e+38, %v882_v24  ;;  %v976_v2 = vmul.f32 %v975_v12, %v930_v35  ;;  %1366 = vst [vmem:[%s2126_s8 + $0x48] sm:$0xff] %v993_v0  ;;  %v1011_v57 = vadd.f32 %v1007_v59, %v1003_v58 }
  0xd3   : > { %v898_v3 = vmax.f32 %v890_v61, 0.2  ;;  %1364 = vst [vmem:[%s2126_s8 + $0x38] sm:$0xff] %v894_v62  ;;  %v1012_v63 = vadd.f32 %v1008_v53, %v1004_v60  ;;  %v1022_v15 = vadd.f32 %v1369_v31, %v1001_v44  ;;  %v1023_v42 = vadd.f32 %v1370_v28, %v1002_v51 }
  0xd4   : > { %v994_v37 = vsel %vm922_vm11, %v976_v2, 0.0  ;;  %1014 = vst [vmem:[%s2408_s17 + $0x8] sm:$0xff] %v1010_v46  ;;  %v1024_v19 = vadd.f32 %v1371_v5, %v1003_v58  ;;  %v1025_v1 = vadd.f32 %v1372_v17, %v1004_v60  ;;  %v1036_v7 = vadd.f32 %v1377_v18, %v1001_v44 }
  0xd5   : > { %902 = vst [vmem:[%s2126_s8 + $0x18] sm:$0xff] %v898_v3  ;;  %v919_v43 = vsub.f32 %v894_v62, %v898_v3  ;;  %v1037_v54 = vadd.f32 %v1378_v22, %v1002_v51  ;;  %v1038_v14 = vadd.f32 %v1379_v4, %v1003_v58  ;;  %v1039_v26 = vadd.f32 %v1380_v25, %v1004_v60 }
  0xd6   : > { %1367 = vst [vmem:[%s2126_s8 + $0x50] sm:$0xff] %v994_v37  ;;  %v927_v33 = vsub.f32 %v915_v55, %v898_v3 }
  0xd7   : > { %1554 = vrcp.f32 %v919_v43  ;;  %1015 = vst [vmem:[%s2408_s17 + $0x10] sm:$0xff] %v1011_v57  ;;  %v988_v34 = vand.u32 2147483648, %v919_v43  ;;  %vm982_vm12 = vweird.f32 %v919_v43  ;;  %v986_v20 = vand.u32 2147483647, %v919_v43 }
  0xd8   : > { %1016 = vst [vmem:[%s2408_s17 + $0x18] sm:$0xff] %v1012_v63  ;;  %v931_v36 = vmax.f32 %v927_v33, 0.0  ;;  %vm923_vm0 = vcmp.gt.f32.partialorder %v919_v43, 0.0 }
  0xd9   : > { %1373 = vst [vmem:[%s2408_s17 + $0x20] sm:$0xff] %v1022_v15  ;;  %v989_v35 = vor.u32 1.1754944e-38, %v988_v34  ;;  %vm987_vm15 = vcmp.eq.f32.partialorder %v986_v20, 8.507059e+37 }
  0xda   : > { %1374 = vst [vmem:[%s2408_s17 + $0x28] sm:$0xff] %v1023_v42 }
  0xdb   : > { %1375 = vst [vmem:[%s2408_s17 + $0x30] sm:$0xff] %v1024_v19 }
  0xdc   : > { %1376 = vst [vmem:[%s2408_s17 + $0x38] sm:$0xff] %v1025_v1 }
  0xdd   : > { %v1555_v23 = vpop.eup %1554  ;;  %1381 = vst [vmem:[%s2408_s17 + $0x40] sm:$0xff] %v1036_v7 }
  0xde   : > { %v978_v32 = vmul.f32 %v1555_v23, %v919_v43  ;;  %1382 = vst [vmem:[%s2408_s17 + $0x48] sm:$0xff] %v1037_v54  ;;  %vm983_vm13 = vweird.f32 %v1555_v23 }
  0xdf   : > { %1383 = vst [vmem:[%s2408_s17 + $0x50] sm:$0xff] %v1038_v14  ;;  %vm984_vm14 = vmor %vm982_vm12, %vm983_vm13 }
  0xe0   : > { %v979_v6 = vsub.f32 1.0, %v978_v32  ;;  %1384 = vst [vmem:[%s2408_s17 + $0x58] sm:$0xff] %v1039_v26 }
  0xe2   : > { %v980_v16 = vmul.f32 %v1555_v23, %v979_v6 }
  0xe4   : > { %v981_v39 = vadd.f32 %v1555_v23, %v980_v16 }
  0xe6   : > { %v985_v13 = vsel %vm984_vm14, %v1555_v23, %v981_v39 }
  0xe7   : > { %v990_v11 = vsel %vm987_vm15, %v989_v35, %v985_v13 }
  0xe8   : > { %v991_v30 = vmul.f32 %v990_v11, %v931_v36 }
  0xea   : > { %v995_v40 = vsel %vm923_vm0, %v991_v30, 0.0 }
  0xeb   : > { %1368 = vst [vmem:[%s2126_s8 + $0x58] sm:$0xff] %v995_v40 }
  0xec   : > { %s1396_s13 = sshll.u32 %s1755_s25, 5  ;;  %s1073_s14 = sshll.u32 %s2126_s8, 4  ;;  %s1074_s14 = int_to_ptr.vmem [resolvable:$true] %s1073_s14 }
  0xed   : > { %s1062_s28 = scalar_lea.hbm %s2502_s5, %s1396_s13  ;;  %s1685_s23 = smov 512  }
  0xee   : > { %s1075_s30 = sshll.u32 %s1062_s28, 4  ;;  %1433 = sst [smem:[#allocation21]] (%p1782_p9), %s1685_s23  ;;  %s1076_s30 = int_to_ptr.hbm [resolvable:$true] %s1075_s30 }
  0xef   : > { %s1686_s7 = smov 2048   ;;  %s1687_s26 = smov 4  }
  0xf0   : > { %1434 = sst [smem:[#allocation21 + $0x1]] (%p1782_p9), %s1686_s7  ;;  %s1688_s25 = smov 128  }
  0xf1   : > { %1435 = sst [smem:[#allocation21 + $0x2]] (%p1782_p9), %s1687_s26  ;;  %s1689_s27 = smov 8  }
  0xf2   : > { %1436 = sst [smem:[#allocation21 + $0x3]] (%p1782_p9), %s1688_s25  ;;  %s1690_s11 = smov [#allocation20]  }
  0xf3   : > { %1437 = sst [smem:[#allocation21 + $0x4]] (%p1782_p9), %s1688_s25  ;;  %s1691_s19 = smov 0  }
  0xf4   : > { %1438 = sst [smem:[#allocation21 + $0x5]] (%p1782_p9), %s1689_s27 }
  0xf5   : > { %1439 = dma.general (%p1782_p9), %s1074_s14, 1536, %s1076_s30, %s1046_s16, %s1690_s11, [#allocation21], %s1691_s19, 0  }
  0xf6   : > { %s1102_s8 = scalar_lea.hbm %s2503_s6, %s1396_s13  ;;  %s1113_s1 = sshll.u32 %s2408_s17, 4  ;;  %s1114_s1 = int_to_ptr.vmem [resolvable:$true] %s1113_s1 }
  0xf7   : > { %s1115_s29 = sshll.u32 %s1102_s8, 4  ;;  %s1692_s20 = smov 512   ;;  %s1116_s29 = int_to_ptr.hbm [resolvable:$true] %s1115_s29 }
  0xf8   : > { %1440 = sst [smem:[#allocation23]] (%p1782_p9), %s1692_s20  ;;  %s1693_s16 = smov 2048  }
  0xf9   : > { %1441 = sst [smem:[#allocation23 + $0x1]] (%p1782_p9), %s1693_s16  ;;  %s1694_s14 = smov 4  }
  0xfa   : > { %1442 = sst [smem:[#allocation23 + $0x2]] (%p1782_p9), %s1694_s14  ;;  %s1695_s28 = smov 128  }
  0xfb   : > { %1443 = sst [smem:[#allocation23 + $0x3]] (%p1782_p9), %s1695_s28  ;;  %s1696_s17 = smov 8  }
  0xfc   : > { %1444 = sst [smem:[#allocation23 + $0x4]] (%p1782_p9), %s1695_s28  ;;  %s1697_s13 = smov [#allocation22]  }
  0xfd   : > { %1445 = sst [smem:[#allocation23 + $0x5]] (%p1782_p9), %s1696_s17  ;;  %s1698_s30 = smov 0  }
  0xfe   : > { %1446 = dma.general (%p1782_p9), %s1114_s1, 1536, %s1116_s29, %s1051_s12, %s1697_s13, [#allocation23], %s1698_s30, 0  }
  0xff PF: > { %p1456_p5 = scmp.ge.s32.totalorder %s1662_s24, 2  ;;  %s1143_s23 = sand.u32 1, %s1650_s21  }
 0x100   : > { %s1144_s7 = scalar_lea.sflag [#allocation4], %s1143_s23 }
 0x101   : > { %p1450_p6 = pnand %p1456_p5, %p1786_p10 }
 0x103   : > { %p1451_p7 = pneg %p1450_p6 }
 0x105   : > { %1641 = dma.done.wait (%p1451_p7), %s1144_s7, 1536  }
 0x106   : > { %1643 = vsyncadd (%p1451_p7), %s1144_s7, 4294965760  ;;  %s1154_s26 = scalar_lea.sflag [#allocation13], %s1143_s23 }
 0x107   : > { %1645 = dma.done.wait (%p1451_p7), %s1154_s26, 1536  }
 0x108   : > { %1647 = vsyncadd (%p1451_p7), %s1154_s26, 4294965760  ;;  %s2580_s24 = sld [smem:[#allocation33_spill]]  ;;  %s2583_s21 = smov %s1654_s22 }
 0x109   : > { %s2581_s9 = sld [smem:[#allocation32_spill]] }
 0x10a   : > { %s2582_s23 = sld [smem:[#allocation34_spill]] }
 0x10e   : > { %p29_p9 = scmp.ge.s32.totalorder %s2580_s24, 6  }
 0x10f   : > { %s2584_s22 = smov %s2581_s9 }
 0x110   :  { %31 = sbr.rel (!%p29_p9) target bundleno = 14 (0xe), region = 185 }
 0x115   :  { %1160 = vsyncpa [#allocation3], 1 }
 0x116   :  { %1162 = vsyncpa [#allocation3 + $0x1], 1 }
 0x117   :  { %1163 = vsyncpa [#allocation6], 1 }
 0x118   :  { %1165 = vsyncpa [#allocation6 + $0x1], 1 }
 0x119   :  { %1166 = vsyncpa [#allocation9], 1 }
 0x11a   :  { %1168 = vsyncpa [#allocation9 + $0x1], 1 }
 0x11b   :  { %1169 = vsyncpa [#allocation4], 1 }
 0x11c   :  { %1171 = vsyncpa [#allocation4 + $0x1], 1 }
 0x11d   :  { %1172 = vsyncpa [#allocation13], 1 }
 0x11e   :  { %1174 = vsyncpa [#allocation13 + $0x1], 1 }

</bundles_post_ra>
